<compile_context>
chip_gen: v5e
topology: v5e:2x2
jax: 0.10.0
libtpu: 0.0.40
codegen_flags: <defaults>
</compile_context>

<pallas_src>
import functools
import math

import jax
import jax.numpy as jnp
import numpy as np
from jax.experimental import pallas as pl
from jax.experimental.pallas import tpu as pltpu


def _round_up(a: int, b: int) -> int:
    return -(-a // b) * b


def _freq_enc_kernel(*refs, n_freqs, in_channels, apply_mask, fuse_transpose):
    """One row-tile of the frequency encoding.

    refs = (x_ref, freq_ref[, mask_ref], o_ref)
      x_ref:    (C, T)     input rows on the lane axis (T % 128 == 0)
      freq_ref: (N*C, 1)   row f*C + c == freq_bands[f]
      mask_ref: (N*C, 1)   row f*C + c == mask[f]       (only when apply_mask)
      o_ref:    fused    -> (T, 2*N*C)  row-major, final torch column order
                fallback -> (2*N*C, T)  channels-first, final column order
    """
    if apply_mask:
        x_ref, freq_ref, mask_ref, o_ref = refs
    else:
        x_ref, freq_ref, o_ref = refs
        mask_ref = None

    C = in_channels
    nf = n_freqs
    nc = nf * C
    x = x_ref[...]                                           # (C, T) f32

    # Replicate x to (N*C, T) with 8-sublane-aligned pieces where possible so
    # the concat needs no sublane-shift shuffles (perf feedback #3).
    if nf == 1:
        x_rep = x
    elif C % 8 != 0 and 8 % C == 0 and nc % 8 == 0:
        group = jnp.concatenate([x] * (8 // C), axis=0)      # (8, T), vreg-aligned
        x_rep = jnp.concatenate([group] * (nc // 8), axis=0)  # (nc, T)
    else:
        x_rep = jnp.concatenate([x] * nf, axis=0)            # (nc, T)

    arg = x_rep * freq_ref[...]                              # per-sublane freq, lane bcast
    s = jnp.sin(arg)                                         # full sublane/lane packing
    c = jnp.cos(arg)
    if apply_mask:                                           # static; skipped when mask==1
        m = mask_ref[...]
        s = s * m
        c = c * m

    # Interleave C-row groups into the reference column order:
    #   row (2f+0)*C + c -> sin(freq_f * x_c), row (2f+1)*C + c -> cos(...)
    # so no 4-D permute is ever needed on the large output.
    pieces = []
    for f in range(nf):
        pieces.append(s[f * C:(f + 1) * C])
        pieces.append(c[f * C:(f + 1) * C])
    slab = jnp.concatenate(pieces, axis=0)                   # (2*nc, T)

    if fuse_transpose:
        # Fuse the row<->column permutation here on the (otherwise idle) XLU
        # instead of a second full HBM pass in the wrapper (perf feedback #1).
        # Pad the small sublane dim up to a lane multiple before transposing,
        # then slice the real columns back off and store dense row-major rows.
        ncols = 2 * nc
        p = _round_up(ncols, 128)
        if p != ncols:
            t = slab.shape[1]
            slab = jnp.concatenate(
                [slab, jnp.zeros((p - ncols, t), slab.dtype)], axis=0)
        o_ref[...] = slab.T[:, :ncols]                       # (T, 2*nc)
    else:
        o_ref[...] = slab                                    # (2*nc, T), dense lane stores


class VanillaFrequencyPallas:
    """JAX/Pallas port of VanillaFrequency."""

    _LANE = 128
    _SUBLANE = 8
    _MAX_TILE_ROWS = 32768                 # rows (lanes) per grid step, hard cap
    _TILE_VMEM_BUDGET = 22 * 1024 * 1024   # target VMEM for blocks + temporaries
    _VMEM_LIMIT = 48 * 1024 * 1024         # scoped limit (fits v7x's 64 MiB VMEM)
    _FUSED_OK = None                       # class-level probe cache

    def __init__(self, in_channels: int, config: dict):
        self.N_freqs = int(config["n_frequencies"])
        self.in_channels = in_channels
        self.n_input_dims = in_channels
        # 2 ** linspace(0, N-1, N) (exact powers of two)
        self.freq_bands = tuple(
            float(v) for v in (2.0 ** np.linspace(0.0, self.N_freqs - 1, self.N_freqs))
        )
        self.n_output_dims = self.in_channels * (2 * self.N_freqs)
        self.n_masking_step = config.get("n_masking_step", 0)
        self.update_step(None, None)

    def update_step(self, epoch, global_step):
        if self.n_masking_step <= 0 or global_step is None:
            self.mask = jnp.ones((self.N_freqs,), dtype=jnp.float32)
            self._mask_trivial = True      # skip the mask multiply / DMA entirely
        else:
            ramp = (global_step / self.n_masking_step * self.N_freqs
                    - jnp.arange(0, self.N_freqs, dtype=jnp.float32))
            self.mask = (1.0 - jnp.cos(math.pi * jnp.clip(ramp, 0.0, 1.0))) / 2.0
            self._mask_trivial = False
        # TODO(synk): rank_zero_debug logging from the torch module is omitted.

    def __call__(self, x):
        apply_mask = (self.n_masking_step > 0) and (not self._mask_trivial)
        cls = type(self)
        if cls._FUSED_OK is None:
            try:
                y = self._forward(x, self.mask, fused=True, apply_mask=apply_mask)
                y = jax.block_until_ready(y)
                cls._FUSED_OK = True
                return y
            except Exception:
                # Mosaic on this build could not lower the fused in-kernel
                # transpose; degrade to channels-first kernel output + a single
                # 2-D XLA transpose in the wrapper (still no 4-D permute).
                cls._FUSED_OK = False
        return self._forward(x, self.mask, fused=cls._FUSED_OK, apply_mask=apply_mask)

    def _pick_tile(self, r_pad: int, fused: bool) -> int:
        C, nf = self.in_channels, self.N_freqs
        L, S = self._LANE, self._SUBLANE
        nc = nf * C
        nc_s = _round_up(nc, S)
        ncols = 2 * nc
        ncols_s = _round_up(ncols, S)
        p = _round_up(ncols, L)
        # Bytes of VMEM per output row (= per lane of the compute slab):
        # double-buffered input/output blocks PLUS the live f32 temporaries
        # (x_rep / arg / sin / cos / interleaved slab [/ lane-padded slab and
        # its transpose]); no buffer reuse assumed (perf feedback #4).
        in_bytes = 2 * _round_up(C, S) * 4
        if fused:
            out_bytes = 2 * p * 4                    # (tile, ncols) block, lane-padded
            tmp_bytes = (4 * nc_s + ncols_s + 2 * p) * 4
        else:
            out_bytes = 2 * ncols_s * 4              # (ncols, tile) block, dense lanes
            tmp_bytes = (4 * nc_s + ncols_s) * 4
        per_row = in_bytes + out_bytes + tmp_bytes
        tile = (self._TILE_VMEM_BUDGET // per_row) // L * L
        tile = max(L, min(self._MAX_TILE_ROWS, tile))
        tile = min(tile, r_pad)
        # v7x has 2 TensorCores: keep >= 2 grid steps for mid/large inputs so
        # the "parallel" row axis can split across cores (no effect on v5e/v6e).
        if r_pad >= 4096:
            tile = min(tile, _round_up(-(-r_pad // 2), L))
        return tile

    @functools.partial(jax.jit, static_argnums=(0,),
                       static_argnames=("fused", "apply_mask"))
    def _forward(self, x, mask, *, fused, apply_mask):
        orig_shape = x.shape
        C = self.in_channels
        nf = self.N_freqs
        nc = nf * C
        ncols = 2 * nc
        assert orig_shape[-1] == C, "last dim of x must equal in_channels"
        rows = int(np.prod(orig_shape[:-1]))

        # Keep the cheap input-side transpose: rows go on the lane axis; reading
        # x in native (rows, C) layout would blow up VMEM 32x (feedback #8).
        xT = x.reshape(rows, C).astype(jnp.float32).T             # (C, rows)
        r_pad = _round_up(rows, self._LANE)
        if r_pad != rows:
            xT = jnp.pad(xT, ((0, 0), (0, r_pad - rows)))

        tile = self._pick_tile(r_pad, fused)
        num_tiles = pl.cdiv(r_pad, tile)

        # Per-output-row frequency column: row f*C + c carries freq_bands[f].
        # Kept as a tiny pipeline-invariant input (constant index_map block).
        freq_col = jnp.asarray(
            np.repeat(np.asarray(self.freq_bands, np.float32), C).reshape(nc, 1))

        in_specs = [
            pl.BlockSpec((C, tile), lambda i: (0, i)),
            pl.BlockSpec((nc, 1), lambda i: (0, 0)),
        ]
        args = [xT, freq_col]
        if apply_mask:
            mask_col = jnp.repeat(mask.astype(jnp.float32), C).reshape(nc, 1)
            in_specs.append(pl.BlockSpec((nc, 1), lambda i: (0, 0)))
            args.append(mask_col)

        if fused:
            out_shape = jax.ShapeDtypeStruct((r_pad, ncols), jnp.float32)
            out_specs = pl.BlockSpec((tile, ncols), lambda i: (i, 0))
        else:
            out_shape = jax.ShapeDtypeStruct((ncols, r_pad), jnp.float32)
            out_specs = pl.BlockSpec((ncols, tile), lambda i: (0, i))

        kernel = functools.partial(
            _freq_enc_kernel, n_freqs=nf, in_channels=C,
            apply_mask=apply_mask, fuse_transpose=fused)

        out = pl.pallas_call(
            kernel,
            out_shape=out_shape,
            grid=(num_tiles,),
            in_specs=in_specs,
            out_specs=out_specs,
            compiler_params=pltpu.CompilerParams(
                dimension_semantics=("parallel",),
                vmem_limit_bytes=self._VMEM_LIMIT),
        )(*args)

        if fused:
            out = out[:rows]                    # already row-major, final column order
        else:
            out = out[:, :rows].T               # single plain 2-D transpose (no 4-D permute)
        return out.reshape(*orig_shape[:-1], ncols)


def _reference(x, freq_bands, mask):
    # Pure-JAX reference mirroring the torch forward loop.
    outs = []
    for f, freq in enumerate(freq_bands):
        for func in (jnp.sin, jnp.cos):
            outs.append(func(freq * x) * mask[f])
    return jnp.concatenate(outs, axis=-1)


if __name__ == "__main__":
    in_channels = 4
    key = jax.random.PRNGKey(0)

    # Case 1: no masking (mask == 1, static fast path, mask input elided).
    enc = VanillaFrequencyPallas(in_channels, {"n_frequencies": 6, "n_masking_step": 0})
    x = jax.random.normal(key, (2, 16, in_channels), dtype=jnp.float32)
    y = jax.block_until_ready(enc(x))
    y_ref = _reference(x, enc.freq_bands, enc.mask)
    assert y.shape == (2, 16, enc.n_output_dims), y.shape
    np.testing.assert_allclose(np.asarray(y), np.asarray(y_ref), atol=1e-5, rtol=1e-5)

    # Case 2: progressive frequency masking enabled + ragged row count.
    enc2 = VanillaFrequencyPallas(in_channels, {"n_frequencies": 6, "n_masking_step": 10})
    enc2.update_step(None, 4)
    x2 = jax.random.normal(jax.random.PRNGKey(1), (3, 40, in_channels), dtype=jnp.float32)
    y2 = jax.block_until_ready(enc2(x2))
    y2_ref = _reference(x2, enc2.freq_bands, enc2.mask)
    assert y2.shape == (3, 40, enc2.n_output_dims), y2.shape
    np.testing.assert_allclose(np.asarray(y2), np.asarray(y2_ref), atol=1e-5, rtol=1e-5)

    print("KERNEL_OK")
</pallas_src>

<mosaic_0001>
module attributes {stable_mosaic.version = 11 : i64} {
  func.func @_freq_enc_kernel(%arg0: i32, %arg1: memref<4x128xf32, #tpu.memory_space<vmem>>, %arg2: memref<24x1xf32, #tpu.memory_space<vmem>>, %arg3: memref<128x48xf32, #tpu.memory_space<vmem>>) attributes {dimension_semantics = [#tpu.dimension_semantics<parallel>], iteration_bounds = array<i64: 1>, scalar_prefetch = 0 : i64, scratch_operands = 0 : i64, tpu.core_type = #tpu.core_type<tc>, window_params = [{transform_indices = @transform_0, window_bounds = array<i64: 4, 128>}, {pipeline_mode = #tpu.pipeline_mode<synchronous>, transform_indices = @transform_1, window_bounds = array<i64: 24, 1>}, {transform_indices = @transform_2, window_bounds = array<i64: 128, 48>}]} {
    %c0 = arith.constant 0 : index
    %c0_0 = arith.constant 0 : index
    %0 = vector.load %arg1[%c0, %c0_0] : memref<4x128xf32, #tpu.memory_space<vmem>>, vector<4x128xf32>
    %1 = tpu.concatenate %0, %0 in 0 : vector<4x128xf32>, vector<4x128xf32> -> vector<8x128xf32>
    %2 = tpu.concatenate %1, %1, %1 in 0 : vector<8x128xf32>, vector<8x128xf32>, vector<8x128xf32> -> vector<24x128xf32>
    %c0_1 = arith.constant 0 : index
    %c0_2 = arith.constant 0 : index
    %3 = vector.load %arg2[%c0_1, %c0_2] : memref<24x1xf32, #tpu.memory_space<vmem>>, vector<24x1xf32>
    %4 = vector.broadcast %3 : vector<24x1xf32> to vector<24x128xf32>
    %5 = arith.mulf %2, %4 : vector<24x128xf32>
    %6 = math.sin %5 : vector<24x128xf32>
    %7 = math.cos %5 : vector<24x128xf32>
    %8 = vector.extract_strided_slice %6 {offsets = [0, 0], sizes = [4, 128], strides = [1, 1]} : vector<24x128xf32> to vector<4x128xf32>
    %9 = vector.extract_strided_slice %7 {offsets = [0, 0], sizes = [4, 128], strides = [1, 1]} : vector<24x128xf32> to vector<4x128xf32>
    %10 = vector.extract_strided_slice %6 {offsets = [4, 0], sizes = [4, 128], strides = [1, 1]} : vector<24x128xf32> to vector<4x128xf32>
    %11 = vector.extract_strided_slice %7 {offsets = [4, 0], sizes = [4, 128], strides = [1, 1]} : vector<24x128xf32> to vector<4x128xf32>
    %12 = vector.extract_strided_slice %6 {offsets = [8, 0], sizes = [4, 128], strides = [1, 1]} : vector<24x128xf32> to vector<4x128xf32>
    %13 = vector.extract_strided_slice %7 {offsets = [8, 0], sizes = [4, 128], strides = [1, 1]} : vector<24x128xf32> to vector<4x128xf32>
    %14 = vector.extract_strided_slice %6 {offsets = [12, 0], sizes = [4, 128], strides = [1, 1]} : vector<24x128xf32> to vector<4x128xf32>
    %15 = vector.extract_strided_slice %7 {offsets = [12, 0], sizes = [4, 128], strides = [1, 1]} : vector<24x128xf32> to vector<4x128xf32>
    %16 = vector.extract_strided_slice %6 {offsets = [16, 0], sizes = [4, 128], strides = [1, 1]} : vector<24x128xf32> to vector<4x128xf32>
    %17 = vector.extract_strided_slice %7 {offsets = [16, 0], sizes = [4, 128], strides = [1, 1]} : vector<24x128xf32> to vector<4x128xf32>
    %18 = vector.extract_strided_slice %6 {offsets = [20, 0], sizes = [4, 128], strides = [1, 1]} : vector<24x128xf32> to vector<4x128xf32>
    %19 = vector.extract_strided_slice %7 {offsets = [20, 0], sizes = [4, 128], strides = [1, 1]} : vector<24x128xf32> to vector<4x128xf32>
    %20 = tpu.concatenate %8, %9, %10, %11, %12, %13, %14, %15, %16, %17, %18, %19 in 0 : vector<4x128xf32>, vector<4x128xf32>, vector<4x128xf32>, vector<4x128xf32>, vector<4x128xf32>, vector<4x128xf32>, vector<4x128xf32>, vector<4x128xf32>, vector<4x128xf32>, vector<4x128xf32>, vector<4x128xf32>, vector<4x128xf32> -> vector<48x128xf32>
    %cst = arith.constant 0.000000e+00 : f32
    %21 = vector.broadcast %cst : f32 to vector<80x128xf32>
    %22 = tpu.concatenate %20, %21 in 0 : vector<48x128xf32>, vector<80x128xf32> -> vector<128x128xf32>
    %23 = tpu.transpose %22, [1, 0] : vector<128x128xf32> -> vector<128x128xf32>
    %24 = vector.extract_strided_slice %23 {offsets = [0, 0], sizes = [128, 48], strides = [1, 1]} : vector<128x128xf32> to vector<128x48xf32>
    %c0_3 = arith.constant 0 : index
    %c0_4 = arith.constant 0 : index
    %25 = vector.load %arg3[%c0_3, %c0_4] : memref<128x48xf32, #tpu.memory_space<vmem>>, vector<128x48xf32>
    tpu.vector_store %arg3[%c0_3, %c0_4], %24 {strides = array<i32>} : memref<128x48xf32, #tpu.memory_space<vmem>>, vector<128x48xf32>,
    return
  }
  func.func @transform_0(%arg0: i32) -> (i32, i32) {
    %c0_i32 = arith.constant 0 : i32
    %c0_i32_0 = arith.constant 0 : i32
    return %c0_i32, %arg0 : i32, i32
  }
  func.func @transform_1(%arg0: i32) -> (i32, i32) {
    %c0_i32 = arith.constant 0 : i32
    %c0_i32_0 = arith.constant 0 : i32
    %c0_i32_1 = arith.constant 0 : i32
    return %c0_i32, %c0_i32_0 : i32, i32
  }
  func.func @transform_2(%arg0: i32) -> (i32, i32) {
    %c0_i32 = arith.constant 0 : i32
    %c0_i32_0 = arith.constant 0 : i32
    return %arg0, %c0_i32 : i32, i32
  }
}

module attributes {stable_mosaic.version = 11 : i64} {
  func.func @_freq_enc_kernel(%arg0: i32, %arg1: memref<4x128xf32, #tpu.memory_space<vmem>>, %arg2: memref<24x1xf32, #tpu.memory_space<vmem>>, %arg3: memref<48x128xf32, #tpu.memory_space<vmem>>) attributes {dimension_semantics = [#tpu.dimension_semantics<parallel>], iteration_bounds = array<i64: 1>, scalar_prefetch = 0 : i64, scratch_operands = 0 : i64, tpu.core_type = #tpu.core_type<tc>, window_params = [{transform_indices = @transform_0, window_bounds = array<i64: 4, 128>}, {pipeline_mode = #tpu.pipeline_mode<synchronous>, transform_indices = @transform_1, window_bounds = array<i64: 24, 1>}, {transform_indices = @transform_2, window_bounds = array<i64: 48, 128>}]} {
    %c0 = arith.constant 0 : index
    %c0_0 = arith.constant 0 : index
    %0 = vector.load %arg1[%c0, %c0_0] : memref<4x128xf32, #tpu.memory_space<vmem>>, vector<4x128xf32>
    %1 = tpu.concatenate %0, %0 in 0 : vector<4x128xf32>, vector<4x128xf32> -> vector<8x128xf32>
    %2 = tpu.concatenate %1, %1, %1 in 0 : vector<8x128xf32>, vector<8x128xf32>, vector<8x128xf32> -> vector<24x128xf32>
    %c0_1 = arith.constant 0 : index
    %c0_2 = arith.constant 0 : index
    %3 = vector.load %arg2[%c0_1, %c0_2] : memref<24x1xf32, #tpu.memory_space<vmem>>, vector<24x1xf32>
    %4 = vector.broadcast %3 : vector<24x1xf32> to vector<24x128xf32>
    %5 = arith.mulf %2, %4 : vector<24x128xf32>
    %6 = math.sin %5 : vector<24x128xf32>
    %7 = math.cos %5 : vector<24x128xf32>
    %8 = vector.extract_strided_slice %6 {offsets = [0, 0], sizes = [4, 128], strides = [1, 1]} : vector<24x128xf32> to vector<4x128xf32>
    %9 = vector.extract_strided_slice %7 {offsets = [0, 0], sizes = [4, 128], strides = [1, 1]} : vector<24x128xf32> to vector<4x128xf32>
    %10 = vector.extract_strided_slice %6 {offsets = [4, 0], sizes = [4, 128], strides = [1, 1]} : vector<24x128xf32> to vector<4x128xf32>
    %11 = vector.extract_strided_slice %7 {offsets = [4, 0], sizes = [4, 128], strides = [1, 1]} : vector<24x128xf32> to vector<4x128xf32>
    %12 = vector.extract_strided_slice %6 {offsets = [8, 0], sizes = [4, 128], strides = [1, 1]} : vector<24x128xf32> to vector<4x128xf32>
    %13 = vector.extract_strided_slice %7 {offsets = [8, 0], sizes = [4, 128], strides = [1, 1]} : vector<24x128xf32> to vector<4x128xf32>
    %14 = vector.extract_strided_slice %6 {offsets = [12, 0], sizes = [4, 128], strides = [1, 1]} : vector<24x128xf32> to vector<4x128xf32>
    %15 = vector.extract_strided_slice %7 {offsets = [12, 0], sizes = [4, 128], strides = [1, 1]} : vector<24x128xf32> to vector<4x128xf32>
    %16 = vector.extract_strided_slice %6 {offsets = [16, 0], sizes = [4, 128], strides = [1, 1]} : vector<24x128xf32> to vector<4x128xf32>
    %17 = vector.extract_strided_slice %7 {offsets = [16, 0], sizes = [4, 128], strides = [1, 1]} : vector<24x128xf32> to vector<4x128xf32>
    %18 = vector.extract_strided_slice %6 {offsets = [20, 0], sizes = [4, 128], strides = [1, 1]} : vector<24x128xf32> to vector<4x128xf32>
    %19 = vector.extract_strided_slice %7 {offsets = [20, 0], sizes = [4, 128], strides = [1, 1]} : vector<24x128xf32> to vector<4x128xf32>
    %20 = tpu.concatenate %8, %9, %10, %11, %12, %13, %14, %15, %16, %17, %18, %19 in 0 : vector<4x128xf32>, vector<4x128xf32>, vector<4x128xf32>, vector<4x128xf32>, vector<4x128xf32>, vector<4x128xf32>, vector<4x128xf32>, vector<4x128xf32>, vector<4x128xf32>, vector<4x128xf32>, vector<4x128xf32>, vector<4x128xf32> -> vector<48x128xf32>
    %c0_3 = arith.constant 0 : index
    %c0_4 = arith.constant 0 : index
    %21 = vector.load %arg3[%c0_3, %c0_4] : memref<48x128xf32, #tpu.memory_space<vmem>>, vector<48x128xf32>
    tpu.vector_store %arg3[%c0_3, %c0_4], %20 {strides = array<i32>} : memref<48x128xf32, #tpu.memory_space<vmem>>, vector<48x128xf32>,
    return
  }
  func.func @transform_0(%arg0: i32) -> (i32, i32) {
    %c0_i32 = arith.constant 0 : i32
    %c0_i32_0 = arith.constant 0 : i32
    return %c0_i32, %arg0 : i32, i32
  }
  func.func @transform_1(%arg0: i32) -> (i32, i32) {
    %c0_i32 = arith.constant 0 : i32
    %c0_i32_0 = arith.constant 0 : i32
    %c0_i32_1 = arith.constant 0 : i32
    return %c0_i32, %c0_i32_0 : i32, i32
  }
  func.func @transform_2(%arg0: i32) -> (i32, i32) {
    %c0_i32 = arith.constant 0 : i32
    %c0_i32_0 = arith.constant 0 : i32
    return %c0_i32, %arg0 : i32, i32
  }
}

</mosaic_0001>

<bundles_post_ra>
// kernel: _forward.1
= control target key start
LH: loop header
LB: loop body
LE: loop exit
PB: predicated region body
PF: predicated region fallthrough
CT: control target
= control target key end

     0   :  { %v1070_v0 = vmov 0   ;;  %vm15_vm0 = vcmask 1043456   ;;  %v1071_v29 = vmov 683565275   ;;  %v1072_v31 = vmov 2475754826   ;;  %s1555_s1 = inlined_call_operand.vmem [shape: f32[24,1], index: 1, kind: input, shape index: {}]   ;;  %s1556_s0 = inlined_call_operand.vmem [shape: f32[4,128], index: 0, kind: input, shape index: {}]   ;;  %s1557_s2 = inlined_call_operand.vmem [shape: f32[128,48], index: 2, kind: output, shape index: {}]  }
   0x1   :  { %1069 = vset.pattern.permute.xlu1 %v1070_v0  ;;  %1068 = vset.pattern.permute.xlu0 %v1070_v0  ;;  %v19_v1 = vld [vmem:[%s1555_s1 + $0x10] sm:$0xff]  ;;  %v17_v2 = vld [vmem:[%s1555_s1] sm:$0xff]  ;;  %v18_v3 = vld [vmem:[%s1555_s1 + $0x8] sm:$0xff]  ;;  %v1073_v33 = vmov 2131351028  }
   0x2   :  { %32 = vperm.xlu1 %1069, %v19_v1   ;;  %22 = vperm.xlu0 %1068, %v17_v2   ;;  %v11_v4 = vld [vmem:[%s1556_s0] sm:$0xf]  ;;  %v1074_v35 = vmov 2102212464   ;;  %v1075_v37 = vmov 920167782  }
   0x3   :  { %v13_v5 = vrot.slane %v11_v4, 4  ;;  %v1076_v45 = vmov 1326507024  }
   0x5   :  { %v16_v6 = vsel %vm15_vm0, %v11_v4, %v13_v5 }
   0xa   :  { %27 = vperm.xlu0 %1068, %v18_v3  }
  0x74   :  { %v33_v7 = vpop.permute.xlu1 %32  ;;  %v23_v8 = vpop.permute.xlu0 %22 }
  0x75   :  { %v1107_v9 = vmul.f32 %v33_v7, %v16_v6  ;;  %v1109_v10 = vmul.f32 %v23_v8, %v16_v6 }
  0x77   :  { %v351_v11 = vand.u32 2139095040, %v1107_v9  ;;  %v41_v12 = vand.u32 2139095040, %v1109_v10  ;;  %v348_v13 = vand.u32 2147483647, %v1107_v9  ;;  %v38_v22 = vand.u32 2147483647, %v1109_v10 }
  0x79   :  { %v352_v14 = vshrl.u32 %v351_v11, 23  ;;  %v42_v15 = vshrl.u32 %v41_v12, 23  ;;  %v355_v18 = vand.u32 8388607, %v348_v13  ;;  %v1128_v39 = vand.u32 8388607, %v38_v22 }
  0x7b   :  { %v1048_v16 = vadd.s32 4294967169, %v352_v14  ;;  %v1042_v17 = vadd.s32 4294967169, %v42_v15  ;;  %v356_v23 = vor.u32 8388608, %v355_v18  ;;  %v46_v54 = vor.u32 8388608, %v1128_v39 }
  0x7c   :  { %v28_v47 = vpop.permute.xlu0 %27 }
  0x7d   :  { %v358_v19 = vadd.s32 1, %v1048_v16  ;;  %v48_v20 = vadd.s32 1, %v1042_v17  ;;  %v1133_v43 = vshll.u32 %v356_v23, 8  ;;  %v1156_v57 = vmul.f32 %v28_v47, %v16_v6 }
  0x7f   :  { %vm359_vm1 = vcmp.gt.s32.totalorder %v358_v19, 0  ;;  %vm49_vm2 = vcmp.gt.s32.totalorder %v48_v20, 0  ;;  %v397_v60 = vand.u32 65535, %v1133_v43  ;;  %v398_v61 = vshrl.u32 %v1133_v43, 16 }
  0x80   :  { %v360_v21 = vsel %vm359_vm1, %v358_v19, 0  ;;  %v50_v25 = vsel %vm49_vm2, %v48_v20, 0 }
  0x81   :  { %v362_v24 = vand.u32 31, %v360_v21  ;;  %v1117_v26 = vshrl.u32 %v360_v21, 5  ;;  %v1119_v27 = vand.u32 31, %v50_v25  ;;  %v1183_v16 = vshrl.u32 %v50_v25, 5 }
  0x83   :  { %v363_v28 = vsub.s32 32, %v362_v24  ;;  %v365_v30 = vshll.u32 %v1071_v29, %v362_v24  ;;  %v368_v32 = vshll.u32 %v1072_v31, %v362_v24  ;;  %v371_v34 = vshll.u32 %v1073_v33, %v362_v24 }
  0x84   :  { %v374_v36 = vshll.u32 %v1074_v35, %v362_v24  ;;  %v377_v38 = vshll.u32 %v1075_v37, %v362_v24  ;;  %vm380_vm3 = vcmp.lt.s32.totalorder %v1117_v26, 1  ;;  %vm383_vm4 = vcmp.lt.s32.totalorder %v1117_v26, 4 }
  0x85   :  { %v366_v40 = vshrl.u32 %v1072_v31, %v363_v28  ;;  %v369_v41 = vshrl.u32 %v1073_v33, %v363_v28  ;;  %v372_v42 = vshrl.u32 %v1074_v35, %v363_v28  ;;  %v375_v44 = vshrl.u32 %v1075_v37, %v363_v28 }
  0x86   :  { %v378_v46 = vshrl.u32 %v1076_v45, %v363_v28  ;;  %v1144_v51 = vsub.s32 32, %v1119_v27  ;;  %vm382_vm5 = vcmp.lt.s32.totalorder %v1117_v26, 3  ;;  %vm381_vm6 = vcmp.lt.s32.totalorder %v1117_v26, 2 }
  0x87   :  { %v1139_v48 = vor.u32 %v366_v40, %v365_v30  ;;  %v1141_v49 = vor.u32 %v369_v41, %v368_v32  ;;  %v373_v50 = vor.u32 %v372_v42, %v371_v34  ;;  %v376_v52 = vor.u32 %v375_v44, %v374_v36 }
  0x88   :  { %v379_v53 = vor.u32 %v378_v46, %v377_v38  ;;  %v55_v1 = vshll.u32 %v1071_v29, %v1119_v27  ;;  %v56_v2 = vshrl.u32 %v1072_v31, %v1144_v51  ;;  %v58_v5 = vshll.u32 %v1072_v31, %v1119_v27 }
  0x89   :  { %v388_v55 = vsel %vm380_vm3, %v1139_v48, %v1141_v49  ;;  %v392_v56 = vsel %vm380_vm3, %v1141_v49, %v373_v50  ;;  %v389_v58 = vsel %vm383_vm4, %v376_v52, 920167782  ;;  %v59_v6 = vshrl.u32 %v1073_v33, %v1144_v51 }
  0x8a   :  { %v393_v59 = vsel %vm383_vm4, %v379_v53, 1326507024  ;;  %v390_v62 = vsel %vm382_vm5, %v373_v50, %v389_v58  ;;  %v364_v14 = vshrl.u32 %v1071_v29, %v363_v28  ;;  %v385_v15 = vsel %vm383_vm4, %v373_v50, 2102212464 }
  0x8b   :  { %v394_v63 = vsel %vm382_vm5, %v376_v52, %v393_v59  ;;  %v391_v3 = vsel %vm381_vm6, %v388_v55, %v390_v62  ;;  %v1185_v17 = vor.u32 %v56_v2, %v55_v1  ;;  %v1187_v21 = vor.u32 %v59_v6, %v58_v5 }
  0x8c   :  { %v395_v4 = vsel %vm381_vm6, %v392_v56, %v394_v63  ;;  %v421_v11 = vand.u32 65535, %v391_v3  ;;  %v422_v12 = vshrl.u32 %v391_v3, 16  ;;  %v61_v32 = vshll.u32 %v1073_v33, %v1119_v27 }
  0x8d   :  { %v399_v7 = vand.u32 65535, %v395_v4  ;;  %v400_v8 = vshrl.u32 %v395_v4, 16  ;;  %v62_v25 = vshrl.u32 %v1074_v35, %v1144_v51  ;;  %v65_v53 = vshrl.u32 %v1075_v37, %v1144_v51 }
  0x8e   :  { %v423_v23 = vmul.u32 %v421_v11, %v397_v60  ;;  %v424_v24 = vmul.u32 %v422_v12, %v397_v60  ;;  %v425_v30 = vmul.u32 %v421_v11, %v398_v61  ;;  %v426_v40 = vmul.u32 %v422_v12, %v398_v61 }
  0x8f   :  { %v401_v18 = vmul.u32 %v399_v7, %v397_v60  ;;  %v402_v19 = vmul.u32 %v400_v8, %v397_v60  ;;  %v403_v20 = vmul.u32 %v399_v7, %v398_v61  ;;  %v404_v34 = vmul.u32 %v400_v8, %v398_v61 }
  0x90   :  { %v427_v41 = vshll.u32 %v424_v24, 16  ;;  %v429_v42 = vshll.u32 %v425_v30, 16  ;;  %v428_v47 = vshrl.u32 %v424_v24, 16  ;;  %v64_v58 = vshll.u32 %v1074_v35, %v1119_v27 }
  0x91   :  { %v405_v28 = vshll.u32 %v402_v19, 16  ;;  %v407_v36 = vshll.u32 %v403_v20, 16  ;;  %v406_v38 = vshrl.u32 %v402_v19, 16  ;;  %v408_v44 = vshrl.u32 %v403_v20, 16 }
  0x92   :  { %vm431_vm8 = vc.u32 %v423_v23, %v427_v41  ;;  %v433_v52 = vadd.s32 %v427_v41, %v423_v23  ;;  %v67_v61 = vshll.u32 %v1075_v37, %v1119_v27  ;;  %v66_v1 = vor.u32 %v65_v53, %v64_v58 }
  0x93   :  { %vm409_vm7 = vc.u32 %v401_v18, %v405_v28  ;;  %v411_v46 = vadd.s32 %v405_v28, %v401_v18  ;;  %v432_v56 = vsel %vm431_vm8, 1, %v1070_v0  ;;  %v68_v2 = vshrl.u32 %v1076_v45, %v1144_v51 }
  0x94   :  { %v410_v50 = vsel %vm409_vm7, 1, %v1070_v0  ;;  %v434_v60 = vadd.s32 %v432_v56, %v426_v40  ;;  %vm435_vm10 = vc.u32 %v433_v52, %v429_v42  ;;  %v430_v3 = vshrl.u32 %v425_v30, 16 }
  0x95   :  { %v412_v55 = vadd.s32 %v410_v50, %v404_v34  ;;  %vm413_vm9 = vc.u32 %v411_v46, %v407_v36  ;;  %v436_v63 = vsel %vm435_vm10, 1, %v1070_v0  ;;  %v1205_v5 = vor.u32 %v62_v25, %v61_v32 }
  0x96   :  { %v414_v59 = vsel %vm413_vm9, 1, %v1070_v0  ;;  %v438_v4 = vadd.s32 %v436_v63, %v434_v60  ;;  %v196_v6 = vand.u32 2139095040, %v1156_v57  ;;  %v384_v7 = vsel %vm380_vm3, %v364_v14, %v1139_v48 }
  0x97   :  { %v416_v62 = vadd.s32 %v414_v59, %v412_v55  ;;  %v69_v11 = vor.u32 %v68_v2, %v67_v61  ;;  %vm73_vm11 = vcmp.lt.s32.totalorder %v1183_v16, 4  ;;  %v386_v27 = vsel %vm382_vm5, %v1141_v49, %v385_v15 }
  0x98   :  { %v439_v12 = vadd.s32 %v438_v4, %v428_v47  ;;  %vm70_vm12 = vcmp.lt.s32.totalorder %v1183_v16, 1  ;;  %v79_v18 = vsel %vm73_vm11, %v66_v1, 920167782  ;;  %v1220_v20 = vadd.s32 %v433_v52, %v429_v42 }
  0x99   :  { %v417_v8 = vadd.s32 %v416_v62, %v406_v38  ;;  %vm72_vm13 = vcmp.lt.s32.totalorder %v1183_v16, 3  ;;  %v78_v48 = vsel %vm70_vm12, %v1185_v17, %v1187_v21  ;;  %v82_v15 = vsel %vm70_vm12, %v1187_v21, %v1205_v5 }
  0x9a   :  { %v440_v14 = vadd.s32 %v439_v12, %v430_v3  ;;  %v80_v49 = vsel %vm72_vm13, %v1205_v5, %v79_v18  ;;  %v83_v23 = vsel %vm73_vm11, %v69_v11, 1326507024  ;;  %vm71_vm14 = vcmp.lt.s32.totalorder %v1183_v16, 2 }
  0x9b   :  { %v1218_v19 = vadd.s32 %v417_v8, %v408_v44  ;;  %v84_v24 = vsel %vm72_vm13, %v66_v1, %v83_v23  ;;  %v387_v30 = vsel %vm381_vm6, %v384_v7, %v386_v27  ;;  %v1243_v34 = vsel %vm71_vm14, %v78_v48, %v80_v49 }
  0x9c   :  { %v444_v32 = vadd.s32 1, %v440_v14  ;;  %v1247_v28 = vsel %vm71_vm14, %v82_v15, %v84_v24  ;;  %v1253_v36 = vshll.u32 %v46_v54, 8  ;;  %v197_v25 = vshrl.u32 %v196_v6, 23 }
  0x9d   :  { %vm443_vm15 = vc.u32 %v1218_v19, %v1220_v20  ;;  %v441_v26 = vmul.u32 %v1133_v43, %v387_v30  ;;  %v90_v38 = vshrl.u32 %v1247_v28, 16  ;;  %v112_v40 = vshrl.u32 %v1243_v34, 16 }
  0x9e   :  { %v1045_v41 = vadd.s32 4294967169, %v197_v25  ;;  %v445_v42 = vsel %vm443_vm15, %v444_v32, %v440_v14  ;;  %v193_v44 = vand.u32 2147483647, %v1156_v57  ;;  %v87_v46 = vand.u32 65535, %v1253_v36 }
  0x9f   :  { %v89_v50 = vand.u32 65535, %v1247_v28  ;;  %v111_v39 = vand.u32 65535, %v1243_v34  ;;  %v446_v54 = vadd.s32 %v445_v42, %v441_v26  ;;  %v1272_v58 = vshrl.u32 %v1071_v29, %v1144_v51 }
  0xa0   :  { %v203_v47 = vadd.s32 1, %v1045_v41  ;;  %v1264_v52 = vmul.u32 %v90_v38, %v87_v46  ;;  %v1266_v43 = vmul.u32 %v112_v40, %v87_v46  ;;  %v200_v53 = vand.u32 8388607, %v193_v44 }
  0xa1   :  { %v88_v59 = vshrl.u32 %v1253_v36, 16  ;;  %v91_v60 = vmul.u32 %v89_v50, %v87_v46  ;;  %v1275_v61 = vmul.u32 %v111_v39, %v87_v46  ;;  %v447_v62 = vadd.s32 536870912, %v446_v54 }
  0xa2   :  { %vm204_vm1 = vcmp.gt.s32.totalorder %v203_v47, 0  ;;  %v95_v63 = vshll.u32 %v1264_v52, 16  ;;  %v117_v1 = vshll.u32 %v1266_v43, 16  ;;  %v201_v3 = vor.u32 8388608, %v200_v53 }
  0xa3   :  { %v205_v55 = vsel %vm204_vm1, %v203_v47, 0  ;;  %v1298_v49 = vshrl.u32 %v447_v62, 30  ;;  %v1337_v46 = vmul.u32 %v89_v50, %v88_v59  ;;  %v1339_v47 = vmul.u32 %v111_v39, %v88_v59 }
  0xa4   :  { %v207_v56 = vand.u32 31, %v205_v55  ;;  %v1281_v4 = vshrl.u32 %v205_v55, 5  ;;  %vm1307_vm2 = vc.u32 %v1275_v61, %v117_v1  ;;  %vm1312_vm4 = vc.u32 %v91_v60, %v95_v63 }
  0xa5   :  { %v1321_v30 = vshll.u32 %v201_v3, 8  ;;  %v449_v26 = vshll.u32 %v1298_v49, 30  ;;  %v101_v62 = vadd.s32 %v95_v63, %v91_v60  ;;  %v116_v3 = vmul.u32 %v112_v40, %v88_v59 }
  0xa6   :  { %v1279_v2 = vsub.s32 32, %v207_v56  ;;  %v210_v6 = vshll.u32 %v1071_v29, %v207_v56  ;;  %v213_v51 = vshll.u32 %v1072_v31, %v207_v56  ;;  %v216_v11 = vshll.u32 %v1073_v33, %v207_v56 }
  0xa7   :  { %v219_v12 = vshll.u32 %v1074_v35, %v207_v56  ;;  %v222_v48 = vshll.u32 %v1075_v37, %v207_v56  ;;  %vm225_vm3 = vcmp.lt.s32.totalorder %v1281_v4, 1  ;;  %vm228_vm5 = vcmp.lt.s32.totalorder %v1281_v4, 4 }
  0xa8   :  { %v211_v7 = vshrl.u32 %v1072_v31, %v1279_v2  ;;  %v214_v8 = vshrl.u32 %v1073_v33, %v1279_v2  ;;  %v217_v27 = vshrl.u32 %v1074_v35, %v1279_v2  ;;  %v220_v18 = vshrl.u32 %v1075_v37, %v1279_v2 }
  0xa9   :  { %v223_v14 = vshrl.u32 %v1076_v45, %v1279_v2  ;;  %vm227_vm6 = vcmp.lt.s32.totalorder %v1281_v4, 3  ;;  %vm226_vm7 = vcmp.lt.s32.totalorder %v1281_v4, 2  ;;  %v100_v56 = vsel %vm1312_vm4, 1, %v1070_v0 }
  0xaa   :  { %v1300_v31 = vor.u32 %v211_v7, %v210_v6  ;;  %v1302_v15 = vor.u32 %v214_v8, %v213_v51  ;;  %v218_v33 = vor.u32 %v217_v27, %v216_v11  ;;  %v221_v23 = vor.u32 %v220_v18, %v219_v12 }
  0xab   :  { %v224_v24 = vor.u32 %v223_v14, %v222_v48  ;;  %v122_v6 = vsel %vm1307_vm2, 1, %v1070_v0  ;;  %v242_v50 = vand.u32 65535, %v1321_v30  ;;  %v243_v39 = vshrl.u32 %v1321_v30, 16 }
  0xac   :  { %v233_v45 = vsel %vm225_vm3, %v1300_v31, %v1302_v15  ;;  %v234_v32 = vsel %vm228_vm5, %v221_v23, 920167782  ;;  %v237_v34 = vsel %vm225_vm3, %v1302_v15, %v218_v33  ;;  %v1353_v8 = vsub.s32 %v446_v54, %v449_v26 }
  0xad   :  { %v238_v25 = vsel %vm228_vm5, %v224_v24, 1326507024  ;;  %v235_v41 = vsel %vm227_vm6, %v218_v33, %v234_v32  ;;  %v94_v11 = vmul.u32 %v90_v38, %v88_v59  ;;  %v75_v40 = vsel %vm73_vm11, %v1205_v5, 2102212464 }
  0xae   :  { %v239_v42 = vsel %vm227_vm6, %v221_v23, %v238_v25  ;;  %v236_v53 = vsel %vm226_vm7, %v233_v45, %v235_v41  ;;  %v97_v60 = vshll.u32 %v1337_v46, 16  ;;  %v124_v14 = vadd.s32 %v122_v6, %v116_v3 }
  0xaf   :  { %v240_v55 = vsel %vm226_vm7, %v237_v34, %v239_v42  ;;  %v266_v27 = vand.u32 65535, %v236_v53  ;;  %v267_v12 = vshrl.u32 %v236_v53, 16  ;;  %v102_v48 = vadd.s32 %v100_v56, %v94_v11 }
  0xb0   :  { %v244_v51 = vand.u32 65535, %v240_v55  ;;  %v245_v7 = vshrl.u32 %v240_v55, 16  ;;  %v96_v23 = vshrl.u32 %v1264_v52, 16  ;;  %vm1362_vm8 = vc.u32 %v101_v62, %v97_v60 }
  0xb1   :  { %v269_v35 = vmul.u32 %v267_v12, %v242_v50  ;;  %v119_v38 = vshll.u32 %v1339_v47, 16  ;;  %vm451_vm9 = vcmp.lt.s32.totalorder %v1353_v8, 0  ;;  %v268_v59 = vmul.u32 %v266_v27, %v242_v50 }
  0xb2   :  { %v247_v63 = vmul.u32 %v245_v7, %v242_v50  ;;  %v248_v18 = vmul.u32 %v244_v51, %v243_v39  ;;  %v246_v54 = vmul.u32 %v244_v51, %v242_v50  ;;  %v249_v5 = vmul.u32 %v245_v7, %v243_v39 }
  0xb3   :  { %v270_v37 = vmul.u32 %v266_v27, %v243_v39  ;;  %v272_v34 = vshll.u32 %v269_v35, 16  ;;  %v452_v25 = vsub.s32 0, %v1353_v8  ;;  %v271_v26 = vmul.u32 %v267_v12, %v243_v39 }
  0xb4   :  { %v250_v24 = vshll.u32 %v247_v63, 16  ;;  %v252_v45 = vshll.u32 %v248_v18, 16  ;;  %v230_v55 = vsel %vm228_vm5, %v218_v33, 2102212464  ;;  %v104_v3 = vsel %vm1362_vm8, 1, %v1070_v0 }
  0xb5   :  { %v274_v41 = vshll.u32 %v270_v37, 16  ;;  %vm276_vm15 = vc.u32 %v268_v59, %v272_v34  ;;  %v278_v53 = vadd.s32 %v272_v34, %v268_v59  ;;  %v251_v6 = vshrl.u32 %v247_v63, 16 }
  0xb6   :  { %vm254_vm10 = vc.u32 %v246_v54, %v250_v24  ;;  %v256_v32 = vadd.s32 %v250_v24, %v246_v54  ;;  %v277_v62 = vsel %vm276_vm15, 1, %v1070_v0  ;;  %v209_v39 = vshrl.u32 %v1071_v29, %v1279_v2 }
  0xb7   :  { %v255_v52 = vsel %vm254_vm10, 1, %v1070_v0  ;;  %v279_v51 = vadd.s32 %v277_v62, %v271_v26  ;;  %vm280_vm1 = vc.u32 %v278_v53, %v274_v41  ;;  %v253_v7 = vshrl.u32 %v248_v18, 16 }
  0xb8   :  { %v257_v42 = vadd.s32 %v255_v52, %v249_v5  ;;  %vm258_vm11 = vc.u32 %v256_v32, %v252_v45  ;;  %v281_v11 = vsel %vm280_vm1, 1, %v1070_v0  ;;  %v106_v27 = vadd.s32 %v104_v3, %v102_v48 }
  0xb9   :  { %v259_v56 = vsel %vm258_vm11, 1, %v1070_v0  ;;  %v273_v12 = vshrl.u32 %v269_v35, 16  ;;  %v283_v60 = vadd.s32 %v281_v11, %v279_v51  ;;  %v123_v54 = vadd.s32 %v117_v1, %v1275_v61 }
  0xba   :  { %v261_v50 = vadd.s32 %v259_v56, %v257_v42  ;;  %v453_v63 = vsel %vm451_vm9, %v452_v25, %v1353_v8  ;;  %v229_v24 = vsel %vm225_vm3, %v209_v39, %v1300_v31  ;;  %v231_v29 = vsel %vm227_vm6, %v1302_v15, %v230_v55 }
  0xbb   :  { %v107_v2 = vadd.s32 %v106_v27, %v96_v23  ;;  %v275_v48 = vshrl.u32 %v270_v37, 16  ;;  %v284_v35 = vadd.s32 %v283_v60, %v273_v12  ;;  %vm125_vm2 = vc.u32 %v123_v54, %v119_v38 }
  0xbc   :  { %v262_v33 = vadd.s32 %v261_v50, %v251_v6  ;;  %v74_v61 = vsel %vm70_vm12, %v1272_v58, %v1185_v17  ;;  %v282_v1 = vadd.s32 %v278_v53, %v274_v41  ;;  %v98_v28 = vshrl.u32 %v1337_v46, 16 }
  0xbd   :  { %v126_v5 = vsel %vm125_vm2, 1, %v1070_v0  ;;  %v118_v31 = vshrl.u32 %v1266_v43, 16  ;;  %v232_v15 = vsel %vm226_vm7, %v229_v24, %v231_v29  ;;  %v285_v23 = vadd.s32 %v284_v35, %v275_v48 }
  0xbe   :  { %v263_v18 = vadd.s32 %v262_v33, %v253_v7  ;;  %v128_v59 = vadd.s32 %v126_v5, %v124_v14  ;;  %v454_v37 = vclz %v453_v63  ;;  %v76_v45 = vsel %vm72_vm13, %v1187_v21, %v75_v40 }
  0xbf   :  { %v108_v32 = vadd.s32 %v107_v2, %v98_v28  ;;  %v289_v17 = vadd.s32 1, %v285_v23  ;;  %v120_v58 = vshrl.u32 %v1339_v47, 16  ;;  %v286_v0 = vmul.u32 %v1321_v30, %v232_v15 }
  0xc0   :  { %vm288_vm3 = vc.u32 %v263_v18, %v282_v1  ;;  %v129_v46 = vadd.s32 %v128_v59, %v118_v31  ;;  %v127_v34 = vadd.s32 %v123_v54, %v119_v38  ;;  %v77_v43 = vsel %vm71_vm14, %v74_v61, %v76_v45 }
  0xc1   :  { %v290_v4 = vsel %vm288_vm3, %v289_v17, %v285_v23  ;;  %v1049_v14 = vadd.s32 4294967294, %v454_v37  ;;  %v131_v21 = vmul.u32 %v1253_v36, %v77_v43  ;;  %v442_v12 = vadd.s32 %v1220_v20, %v1218_v19 }
  0xc2   :  { %v130_v25 = vadd.s32 %v129_v46, %v120_v58  ;;  %v291_v52 = vadd.s32 %v290_v4, %v286_v0  ;;  %vm133_vm12 = vc.u32 %v108_v32, %v127_v34  ;;  %v287_v63 = vadd.s32 %v282_v1, %v263_v18 }
  0xc3   :  { %vm1050_vm13 = vcmp.lt.s32.totalorder %v1049_v14, 0  ;;  %v132_v37 = vadd.s32 %v127_v34, %v108_v32  ;;  %vm195_vm7 = vcmp.lt.s32.totalorder %v1156_v57, 0  ;;  %vm1421_vm8 = vcmp.le.f32.partialorder %v193_v44, 0.7853982 }
  0xc4   :  { %v134_v26 = vadd.s32 1, %v130_v25  ;;  %v292_v40 = vadd.s32 536870912, %v291_v52  ;;  %v457_v53 = vsel %vm1050_vm13, 0, %v1049_v14  ;;  %vm40_vm9 = vcmp.lt.s32.totalorder %v1109_v10, 0 }
  0xc5   :  { %v462_v56 = vsub.s32 4294967266, %v457_v53  ;;  %v458_v11 = vsub.s32 32, %v457_v53  ;;  %v459_v5 = vshll.u32 %v1353_v8, %v457_v53  ;;  %vm350_vm10 = vcmp.lt.s32.totalorder %v1107_v9, 0 }
  0xc6   :  { %v135_v41 = vsel %vm133_vm12, %v134_v26, %v130_v25  ;;  %v1409_v42 = vshrl.u32 %v292_v40, 30  ;;  %vm1434_vm11 = vcmp.le.f32.partialorder %v38_v22, 0.7853982  ;;  %vm1446_vm15 = vcmp.le.f32.partialorder %v348_v13, 0.7853982 }
  0xc7   :  { %v136_v47 = vadd.s32 %v135_v41, %v131_v21  ;;  %v463_v51 = vadd.s32 127, %v462_v56  ;;  %v460_v48 = vshrl.u32 %v442_v12, %v458_v11 }
  0xc8   :  { %v294_v30 = vshll.u32 %v1409_v42, 30 }
  0xc9   :  { %v137_v38 = vadd.s32 536870912, %v136_v47  ;;  %v464_v60 = vshll.u32 %v463_v51, 23  ;;  %v461_v20 = vor.u32 %v460_v48, %v459_v5  ;;  %v317_v48 = vsub.s32 4, %v1409_v42 }
  0xca   :  { %v295_v16 = vsub.s32 %v291_v52, %v294_v30 }
  0xcb   :  { %v1412_v55 = vshrl.u32 %v137_v38, 30  ;;  %v465_v31 = vor.u32 4788187, %v464_v60  ;;  %v468_v14 = vcvt.s32.f32 %v461_v20 }
  0xcc   :  { %vm296_vm14 = vcmp.lt.s32.totalorder %v295_v16, 0  ;;  %v297_v62 = vsub.s32 0, %v295_v16 }
  0xcd   :  { %v139_v3 = vshll.u32 %v1412_v55, 30  ;;  %v466_v46 = vand.u32 2147483647, %v465_v31 }
  0xce   :  { %v298_v6 = vsel %vm296_vm14, %v297_v62, %v295_v16  ;;  %v162_v62 = vsub.s32 4, %v1412_v55 }
  0xcf   :  { %v140_v36 = vsub.s32 %v136_v47, %v139_v3  ;;  %v299_v50 = vclz %v298_v6  ;;  %v469_v26 = vmul.f32 %v468_v14, %v466_v46 }
  0xd1   :  { %vm141_vm4 = vcmp.lt.s32.totalorder %v140_v36, 0  ;;  %v142_v39 = vsub.s32 0, %v140_v36  ;;  %v1046_v7 = vadd.s32 4294967294, %v299_v50  ;;  %v470_v38 = vxor.u32 2147483648, %v469_v26 }
  0xd3   :  { %v143_v27 = vsel %vm141_vm4, %v142_v39, %v140_v36  ;;  %vm1047_vm5 = vcmp.lt.s32.totalorder %v1046_v7, 0  ;;  %v471_v3 = vsel %vm350_vm10, %v470_v38, %v469_v26  ;;  %vm181_vm4 = vweird.f32 %v1109_v10 }
  0xd4   :  { %v144_v33 = vclz %v143_v27  ;;  %v302_v54 = vsel %vm1047_vm5, 0, %v1046_v7  ;;  %v1453_v39 = vsel %vm1446_vm15, %v1107_v9, %v471_v3  ;;  %v163_v7 = vsel %vm40_vm9, %v162_v62, %v1412_v55 }
  0xd5   :  { %v303_v24 = vsub.s32 32, %v302_v54  ;;  %v307_v29 = vsub.s32 4294967266, %v302_v54  ;;  %v304_v35 = vshll.u32 %v295_v16, %v302_v54  ;;  %v165_v13 = vsel %vm1434_vm11, 0, %v163_v7 }
  0xd6   :  { %v1043_v2 = vadd.s32 4294967294, %v144_v33 }
  0xd7   :  { %v305_v61 = vshrl.u32 %v287_v63, %v303_v24  ;;  %v308_v28 = vadd.s32 127, %v307_v29  ;;  %v1458_v63 = vmul.f32 %v1453_v39, %v1453_v39 }
  0xd8   :  { %vm1044_vm6 = vcmp.lt.s32.totalorder %v1043_v2, 0 }
  0xd9   :  { %v147_v15 = vsel %vm1044_vm6, 0, %v1043_v2  ;;  %v306_v23 = vor.u32 %v305_v61, %v304_v35  ;;  %v309_v59 = vshll.u32 %v308_v28, 23  ;;  %v182_v28 = vadd.s32 3, %v165_v13 }
  0xda   :  { %v148_v45 = vsub.s32 32, %v147_v15  ;;  %v152_v19 = vsub.s32 4294967266, %v147_v15  ;;  %v149_v1 = vshll.u32 %v140_v36, %v147_v15  ;;  %v484_v15 = vmul.f32 -0.00019511016, %v1458_v63 }
  0xdb   :  { %v310_v17 = vor.u32 4788187, %v309_v59  ;;  %v313_v43 = vcvt.s32.f32 %v306_v23 }
  0xdc   :  { %v150_v18 = vshrl.u32 %v132_v37, %v148_v45  ;;  %v153_v58 = vadd.s32 127, %v152_v19  ;;  %v318_v37 = vsel %vm195_vm7, %v317_v48, %v1409_v42  ;;  %v647_v45 = vand.u32 3, %v165_v13 }
  0xdd   :  { %v311_v0 = vand.u32 2147483647, %v310_v17  ;;  %v183_v17 = vand.u32 3, %v182_v28  ;;  %v477_v42 = vmul.f32 -0.001358992, %v1458_v63 }
  0xde   :  { %v151_v4 = vor.u32 %v150_v18, %v149_v1  ;;  %v154_v25 = vshll.u32 %v153_v58, 23  ;;  %v485_v58 = vadd.f32 0.008332121, %v484_v15  ;;  %vm648_vm1 = vcmp.lt.s32.totalorder %v647_v45, 2 }
  0xdf   :  { %v314_v52 = vmul.f32 %v313_v43, %v311_v0  ;;  %vm649_vm2 = vcmp.eq.s32.totalorder %v647_v45, 0  ;;  %vm652_vm3 = vcmp.eq.s32.totalorder %v647_v45, 2  ;;  %v320_v43 = vsel %vm1421_vm8, 0, %v318_v37 }
  0xe0   :  { %v155_v8 = vor.u32 4788187, %v154_v25  ;;  %v158_v34 = vcvt.s32.f32 %v151_v4  ;;  %vm184_vm12 = vcmp.lt.s32.totalorder %v183_v17, 2  ;;  %vm185_vm13 = vcmp.eq.s32.totalorder %v183_v17, 0 }
  0xe1   :  { %v315_v21 = vxor.u32 2147483648, %v314_v52  ;;  %vm188_vm14 = vcmp.eq.s32.totalorder %v183_v17, 2  ;;  %v478_v38 = vadd.f32 0.041655596, %v477_v42  ;;  %v337_v3 = vadd.s32 3, %v320_v43 }
  0xe2   :  { %v156_v32 = vand.u32 2147483647, %v155_v8 }
  0xe3   :  { %v316_v41 = vsel %vm195_vm7, %v315_v21, %v314_v52  ;;  %v486_v52 = vmul.f32 %v485_v58, %v1458_v63 }
  0xe4   :  { %v319_v47 = vsel %vm1421_vm8, %v1156_v57, %v316_v41  ;;  %v159_v30 = vmul.f32 %v158_v34, %v156_v32  ;;  %vm336_vm8 = vweird.f32 %v1156_v57 }
  0xe5   :  { %v321_v53 = vmul.f32 %v319_v47, %v319_v47  ;;  %v487_v62 = vadd.f32 -0.16666654, %v486_v52 }
  0xe6   :  { %v160_v16 = vxor.u32 2147483648, %v159_v30 }
  0xe7   :  { %v322_v50 = vmul.f32 -0.001358992, %v321_v53  ;;  %v329_v51 = vmul.f32 -0.00019511016, %v321_v53 }
  0xe8   :  { %v161_v56 = vsel %vm40_vm9, %v160_v16, %v159_v30  ;;  %v801_v16 = vand.u32 3, %v320_v43 }
  0xe9   :  { %v164_v6 = vsel %vm1434_vm11, %v1109_v10, %v161_v56  ;;  %v330_v33 = vadd.f32 0.008332121, %v329_v51  ;;  %v323_v54 = vadd.f32 0.041655596, %v322_v50  ;;  %v488_v50 = vmul.f32 %v487_v62, %v1458_v63 }
  0xea   :  { %v166_v36 = vmul.f32 %v164_v6, %v164_v6  ;;  %vm803_vm5 = vcmp.eq.s32.totalorder %v801_v16, 0  ;;  %v472_v51 = vsub.s32 4, %v1298_v49  ;;  %vm806_vm6 = vcmp.eq.s32.totalorder %v801_v16, 2 }
  0xeb   :  { %v331_v24 = vmul.f32 %v330_v33, %v321_v53  ;;  %v324_v5 = vmul.f32 %v323_v54, %v321_v53  ;;  %vm802_vm7 = vcmp.lt.s32.totalorder %v801_v16, 2 }
  0xec   :  { %v167_v11 = vmul.f32 -0.001358992, %v166_v36  ;;  %v174_v27 = vmul.f32 -0.00019511016, %v166_v36  ;;  %v473_v54 = vsel %vm350_vm10, %v472_v51, %v1298_v49 }
  0xed   :  { %v332_v35 = vadd.f32 -0.16666654, %v331_v24  ;;  %v325_v18 = vadd.f32 -0.4999988, %v324_v5 }
  0xee   :  { %v168_v12 = vadd.f32 0.041655596, %v167_v11  ;;  %v175_v60 = vadd.f32 0.008332121, %v174_v27  ;;  %v338_v11 = vand.u32 3, %v337_v3 }
  0xef   :  { %v333_v31 = vmul.f32 %v332_v35, %v321_v53  ;;  %v326_v25 = vmul.f32 %v325_v18, %v321_v53  ;;  %v475_v35 = vsel %vm1446_vm15, 0, %v473_v54  ;;  %vm491_vm15 = vweird.f32 %v1107_v9 }
  0xf0   :  { %v169_v29 = vmul.f32 %v168_v12, %v166_v36  ;;  %v176_v2 = vmul.f32 %v175_v60, %v166_v36  ;;  %v489_v60 = vadd.f32 1.0, %v488_v50  ;;  %vm340_vm9 = vcmp.eq.s32.totalorder %v338_v11, 0 }
  0xf1   :  { %v334_v1 = vadd.f32 1.0, %v333_v31  ;;  %v327_v30 = vadd.f32 1.0, %v326_v25  ;;  %vm343_vm11 = vcmp.eq.s32.totalorder %v338_v11, 2  ;;  %v955_v5 = vand.u32 3, %v475_v35 }
  0xf2   :  { %v170_v55 = vadd.f32 -0.4999988, %v169_v29  ;;  %v177_v61 = vadd.f32 -0.16666654, %v176_v2 }
  0xf3   :  { %v335_v14 = vmul.f32 %v334_v1, %v319_v47  ;;  %vm957_vm10 = vcmp.eq.s32.totalorder %v955_v5, 0 }
  0xf4   :  { %v171_v23 = vmul.f32 %v170_v55, %v166_v36  ;;  %v178_v59 = vmul.f32 %v177_v61, %v166_v36  ;;  %v479_v36 = vmul.f32 %v478_v38, %v1458_v63  ;;  %v490_v55 = vmul.f32 %v489_v60, %v1453_v39 }
  0xf5   :  { %v341_v56 = vxor.u32 2147483648, %v335_v14 }
  0xf6   :  { %v172_v19 = vadd.f32 1.0, %v171_v23  ;;  %v179_v20 = vadd.f32 1.0, %v178_v59  ;;  %v480_v33 = vadd.f32 -0.4999988, %v479_v36  ;;  %v496_v57 = vxor.u32 2147483648, %v490_v55 }
  0xf7   :  { %v805_v10 = vsel %vm803_vm5, %v327_v30, %v341_v56  ;;  %v342_v24 = vsel %vm340_vm9, %v327_v30, %v341_v56  ;;  %v492_v23 = vadd.s32 3, %v475_v35 }
  0xf8   :  { %v180_v46 = vmul.f32 %v179_v20, %v164_v6  ;;  %v189_v0 = vxor.u32 2147483648, %v172_v19  ;;  %v344_v6 = vxor.u32 2147483648, %v327_v30  ;;  %v481_v2 = vmul.f32 %v480_v33, %v1458_v63 }
  0xf9   :  { %v493_v45 = vand.u32 3, %v492_v23 }
  0xfa   :  { %v186_v4 = vxor.u32 2147483648, %v180_v46  ;;  %v190_v26 = vsel %vm188_vm14, %v189_v0, %v180_v46  ;;  %v654_v32 = vsel %vm652_vm3, %v189_v0, %v180_v46  ;;  %v808_v27 = vsel %vm806_vm6, %v344_v6, %v335_v14 }
  0xfb   :  { %v809_v12 = vsel %vm802_vm7, %v805_v10, %v808_v27  ;;  %v345_v48 = vsel %vm343_vm11, %v344_v6, %v335_v14  ;;  %v482_v28 = vadd.f32 1.0, %v481_v2  ;;  %vm956_vm3 = vcmp.lt.s32.totalorder %v955_v5, 2 }
  0xfc   :  { %v187_v8 = vsel %vm185_vm13, %v172_v19, %v186_v4  ;;  %v651_v21 = vsel %vm649_vm2, %v172_v19, %v186_v4  ;;  %v810_v29 = vsel %vm336_vm8, nan, %v809_v12  ;;  %vm960_vm2 = vcmp.eq.s32.totalorder %v955_v5, 2 }
  0xfd   :  { %v191_v34 = vsel %vm184_vm12, %v187_v8, %v190_v26  ;;  %v655_v40 = vsel %vm648_vm1, %v651_v21, %v654_v32  ;;  %vm339_vm1 = vcmp.lt.s32.totalorder %v338_v11, 2  ;;  %v972_v49 = vrot.slane %v810_v29, 4 }
  0xfe   :  { %v656_v41 = vsel %vm181_vm4, nan, %v655_v40  ;;  %v192_v44 = vsel %vm181_vm4, nan, %v191_v34  ;;  %v346_v61 = vsel %vm339_vm1, %v342_v24, %v345_v48  ;;  %v499_v59 = vxor.u32 2147483648, %v482_v28 }
  0xff   :  { %v966_v53 = vrot.slane %v656_v41, 4  ;;  %v969_v7 = vrot.slane %v192_v44, 4  ;;  %v347_v31 = vsel %vm336_vm8, nan, %v346_v61  ;;  %v959_v63 = vsel %vm957_vm10, %v482_v28, %v496_v57 }
 0x100   :  { %v985_v15 = vsel %vm15_vm0, %v347_v31, %v972_v49  ;;  %v975_v37 = vrot.slane %v347_v31, 4  ;;  %v962_v22 = vsel %vm960_vm2, %v499_v59, %v490_v55  ;;  %vm495_vm12 = vcmp.eq.s32.totalorder %v493_v45, 0 }
 0x101   :  { %v983_v47 = vsel %vm15_vm0, %v192_v44, %v966_v53  ;;  %v984_v13 = vsel %vm15_vm0, %v969_v7, %v656_v41  ;;  %v963_v19 = vsel %vm956_vm3, %v959_v63, %v962_v22  ;;  %v497_v20 = vsel %vm495_vm12, %v482_v28, %v496_v57 }
 0x102   :  { %989 = vxpose.xlu1.b32.start [1/6] (short) %v983_v47, 128  ;;  %v986_v39 = vsel %vm15_vm0, %v975_v37, %v810_v29  ;;  %v964_v17 = vsel %vm491_vm15, nan, %v963_v19  ;;  %vm498_vm13 = vcmp.eq.s32.totalorder %v493_v45, 2  ;;  %vm494_vm14 = vcmp.lt.s32.totalorder %v493_v45, 2 }
 0x103   :  { %v500_v18 = vsel %vm498_vm13, %v499_v59, %v490_v55  ;;  %v978_v58 = vrot.slane %v964_v17, 4  ;;  %vm1021_vm4 = vcmask 392192  }
 0x104   :  { %v501_v1 = vsel %vm494_vm14, %v497_v20, %v500_v18 }
 0x105   :  { %v502_v46 = vsel %vm491_vm15, nan, %v501_v1 }
 0x106   :  { %v987_v0 = vsel %vm15_vm0, %v502_v46, %v978_v58  ;;  %v981_v43 = vrot.slane %v502_v46, 4 }
 0x108   :  { %v988_v4 = vsel %vm15_vm0, %v981_v43, %v964_v17 }
 0x10a   :  { %990 = vxpose.xlu1.b32.cont [2/6] (short) %v984_v13, 128 }
 0x112   :  { %991 = vxpose.xlu1.b32.cont [3/6] (short) %v985_v15, 128 }
 0x11a   :  { %992 = vxpose.xlu1.b32.cont [4/6] (short) %v986_v39, 128 }
 0x122   :  { %993 = vxpose.xlu1.b32.cont [5/6] (short) %v987_v0, 128 }
 0x12a   :  { %994 = vxpose.xlu1.b32.end [6/6] (short) %v988_v4, 128 }
 0x1a6   :  { %v1005_v25 = vpop.trf.xlu1 }
 0x1a7   :  { %1022 = vst.msk [vmem:[%s1557_s2] sm:$0xff] %vm1021_vm4, %v1005_v25 }
 0x1ae   :  { %v1006_v9 = vpop.trf.xlu1 }
 0x1af   :  { %1023 = vst.msk [vmem:[%s1557_s2 + $0x8] sm:$0xff] %vm1021_vm4, %v1006_v9 }
 0x1b6   :  { %v1007_v42 = vpop.trf.xlu1 }
 0x1b7   :  { %1024 = vst.msk [vmem:[%s1557_s2 + $0x10] sm:$0xff] %vm1021_vm4, %v1007_v42 }
 0x1be   :  { %v1008_v14 = vpop.trf.xlu1 }
 0x1bf   :  { %1025 = vst.msk [vmem:[%s1557_s2 + $0x18] sm:$0xff] %vm1021_vm4, %v1008_v14 }
 0x1c6   :  { %v1009_v52 = vpop.trf.xlu1 }
 0x1c7   :  { %1026 = vst.msk [vmem:[%s1557_s2 + $0x20] sm:$0xff] %vm1021_vm4, %v1009_v52 }
 0x1ce   :  { %v1010_v8 = vpop.trf.xlu1 }
 0x1cf   :  { %1027 = vst.msk [vmem:[%s1557_s2 + $0x28] sm:$0xff] %vm1021_vm4, %v1010_v8 }
 0x1d6   :  { %v1011_v26 = vpop.trf.xlu1 }
 0x1d7   :  { %1028 = vst.msk [vmem:[%s1557_s2 + $0x30] sm:$0xff] %vm1021_vm4, %v1011_v26 }
 0x1de   :  { %v1012_v21 = vpop.trf.xlu1 }
 0x1df   :  { %1029 = vst.msk [vmem:[%s1557_s2 + $0x38] sm:$0xff] %vm1021_vm4, %v1012_v21 }
 0x1e6   :  { %v1013_v32 = vpop.trf.xlu1 }
 0x1e7   :  { %1030 = vst.msk [vmem:[%s1557_s2 + $0x40] sm:$0xff] %vm1021_vm4, %v1013_v32 }
 0x1ee   :  { %v1014_v34 = vpop.trf.xlu1 }
 0x1ef   :  { %1031 = vst.msk [vmem:[%s1557_s2 + $0x48] sm:$0xff] %vm1021_vm4, %v1014_v34 }
 0x1f6   :  { %v1015_v40 = vpop.trf.xlu1 }
 0x1f7   :  { %1032 = vst.msk [vmem:[%s1557_s2 + $0x50] sm:$0xff] %vm1021_vm4, %v1015_v40 }
 0x1fe   :  { %v1016_v41 = vpop.trf.xlu1 }
 0x1ff   :  { %1033 = vst.msk [vmem:[%s1557_s2 + $0x58] sm:$0xff] %vm1021_vm4, %v1016_v41 }
 0x206   :  { %v1017_v30 = vpop.trf.xlu1 }
 0x207   :  { %1034 = vst.msk [vmem:[%s1557_s2 + $0x60] sm:$0xff] %vm1021_vm4, %v1017_v30 }
 0x20e   :  { %v1018_v38 = vpop.trf.xlu1 }
 0x20f   :  { %1035 = vst.msk [vmem:[%s1557_s2 + $0x68] sm:$0xff] %vm1021_vm4, %v1018_v38 }
 0x216   :  { %v1019_v53 = vpop.trf.xlu1 }
 0x217   :  { %1036 = vst.msk [vmem:[%s1557_s2 + $0x70] sm:$0xff] %vm1021_vm4, %v1019_v53 }
 0x21e   :  { %v1020_v16 = vpop.trf.xlu1 }
 0x21f   :  { %1037 = vst.msk [vmem:[%s1557_s2 + $0x78] sm:$0xff] %vm1021_vm4, %v1020_v16 }

// kernel: _forward.1
= control target key start
LH: loop header
LB: loop body
LE: loop exit
PB: predicated region body
PF: predicated region fallthrough
CT: control target
= control target key end

     0   :  { %v1026_v0 = vmov 0   ;;  %vm15_vm0 = vcmask 1043456   ;;  %v1027_v34 = vmov 683565275   ;;  %v1028_v36 = vmov 2475754826   ;;  %s1364_s1 = inlined_call_operand.vmem [shape: f32[24,1], index: 1, kind: input, shape index: {}]   ;;  %s1365_s0 = inlined_call_operand.vmem [shape: f32[4,128], index: 0, kind: input, shape index: {}]   ;;  %s1366_s2 = inlined_call_operand.vmem [shape: f32[48,128], index: 2, kind: output, shape index: {}]  }
   0x1   :  { %1025 = vset.pattern.permute.xlu1 %v1026_v0  ;;  %1024 = vset.pattern.permute.xlu0 %v1026_v0  ;;  %v19_v1 = vld [vmem:[%s1364_s1 + $0x10] sm:$0xff]  ;;  %v17_v2 = vld [vmem:[%s1364_s1] sm:$0xff]  ;;  %v18_v3 = vld [vmem:[%s1364_s1 + $0x8] sm:$0xff]  ;;  %v1029_v40 = vmov 2131351028  }
   0x2   :  { %32 = vperm.xlu1 %1025, %v19_v1   ;;  %22 = vperm.xlu0 %1024, %v17_v2   ;;  %v11_v4 = vld [vmem:[%s1365_s0] sm:$0xf]  ;;  %v1030_v43 = vmov 2102212464   ;;  %v1031_v46 = vmov 920167782  }
   0x3   :  { %v13_v5 = vrot.slane %v11_v4, 4  ;;  %v1032_v49 = vmov 1326507024  }
   0x5   :  { %v16_v6 = vsel %vm15_vm0, %v11_v4, %v13_v5 }
   0xa   :  { %27 = vperm.xlu0 %1024, %v18_v3  }
  0x74   :  { %v33_v7 = vpop.permute.xlu1 %32  ;;  %v23_v8 = vpop.permute.xlu0 %22 }
  0x75   :  { %v1063_v9 = vmul.f32 %v23_v8, %v16_v6  ;;  %v1065_v10 = vmul.f32 %v33_v7, %v16_v6 }
  0x77   :  { %v38_v11 = vand.u32 2147483647, %v1063_v9  ;;  %v41_v12 = vand.u32 2139095040, %v1063_v9  ;;  %v351_v13 = vand.u32 2139095040, %v1065_v10 }
  0x79   :  { %v42_v14 = vshrl.u32 %v41_v12, 23  ;;  %v45_v15 = vand.u32 8388607, %v38_v11  ;;  %v352_v16 = vshrl.u32 %v351_v13, 23 }
  0x7b   :  { %v999_v17 = vadd.s32 4294967169, %v42_v14  ;;  %v46_v18 = vor.u32 8388608, %v45_v15  ;;  %v1005_v22 = vadd.s32 4294967169, %v352_v16  ;;  %v348_v15 = vand.u32 2147483647, %v1065_v10 }
  0x7c   :  { %v28_v19 = vpop.permute.xlu0 %27 }
  0x7d   :  { %v1072_v20 = vmul.f32 %v28_v19, %v16_v6  ;;  %v48_v21 = vadd.s32 1, %v999_v17  ;;  %v1074_v23 = vshll.u32 %v46_v18, 8  ;;  %v1078_v28 = vadd.s32 1, %v1005_v22 }
  0x7f   :  { %vm49_vm1 = vcmp.gt.s32.totalorder %v48_v21, 0  ;;  %v193_v25 = vand.u32 2147483647, %v1072_v20  ;;  %v196_v26 = vand.u32 2139095040, %v1072_v20  ;;  %v87_v30 = vand.u32 65535, %v1074_v23 }
  0x80   :  { %v50_v24 = vsel %vm49_vm1, %v48_v21, 0  ;;  %v88_v31 = vshrl.u32 %v1074_v23, 16  ;;  %vm359_vm7 = vcmp.gt.s32.totalorder %v1078_v28, 0 }
  0x81   :  { %v52_v27 = vand.u32 31, %v50_v24  ;;  %v197_v32 = vshrl.u32 %v196_v26, 23  ;;  %v51_v33 = vshrl.u32 %v50_v24, 5  ;;  %v1086_v38 = vand.u32 8388607, %v193_v25 }
  0x83   :  { %v53_v29 = vsub.s32 32, %v52_v27  ;;  %v55_v35 = vshll.u32 %v1027_v34, %v52_v27  ;;  %v58_v37 = vshll.u32 %v1028_v36, %v52_v27  ;;  %v61_v42 = vshll.u32 %v1029_v40, %v52_v27 }
  0x84   :  { %v64_v45 = vshll.u32 %v1030_v43, %v52_v27  ;;  %v67_v48 = vshll.u32 %v1031_v46, %v52_v27  ;;  %v1002_v54 = vadd.s32 4294967169, %v197_v32  ;;  %vm70_vm2 = vcmp.lt.s32.totalorder %v51_v33, 1 }
  0x85   :  { %v56_v39 = vshrl.u32 %v1028_v36, %v53_v29  ;;  %v59_v41 = vshrl.u32 %v1029_v40, %v53_v29  ;;  %v62_v44 = vshrl.u32 %v1030_v43, %v53_v29  ;;  %v65_v47 = vshrl.u32 %v1031_v46, %v53_v29 }
  0x86   :  { %v68_v50 = vshrl.u32 %v1032_v49, %v53_v29  ;;  %vm73_vm3 = vcmp.lt.s32.totalorder %v51_v33, 4  ;;  %v54_v57 = vshrl.u32 %v1027_v34, %v53_v29  ;;  %vm72_vm4 = vcmp.lt.s32.totalorder %v51_v33, 3 }
  0x87   :  { %v57_v51 = vor.u32 %v56_v39, %v55_v35  ;;  %v60_v52 = vor.u32 %v59_v41, %v58_v37  ;;  %v63_v53 = vor.u32 %v62_v44, %v61_v42  ;;  %v66_v55 = vor.u32 %v65_v47, %v64_v45 }
  0x88   :  { %v69_v56 = vor.u32 %v68_v50, %v67_v48  ;;  %v203_v63 = vadd.s32 1, %v1002_v54  ;;  %vm71_vm5 = vcmp.lt.s32.totalorder %v51_v33, 2  ;;  %v201_v14 = vor.u32 8388608, %v1086_v38 }
  0x89   :  { %v75_v58 = vsel %vm73_vm3, %v63_v53, 2102212464  ;;  %v78_v59 = vsel %vm70_vm2, %v57_v51, %v60_v52  ;;  %v82_v60 = vsel %vm70_vm2, %v60_v52, %v63_v53  ;;  %v79_v61 = vsel %vm73_vm3, %v66_v55, 920167782 }
  0x8a   :  { %v83_v62 = vsel %vm73_vm3, %v69_v56, 1326507024  ;;  %v74_v1 = vsel %vm70_vm2, %v54_v57, %v57_v51  ;;  %v80_v2 = vsel %vm72_vm4, %v63_v53, %v79_v61  ;;  %v76_v4 = vsel %vm72_vm4, %v60_v52, %v75_v58 }
  0x8b   :  { %v84_v3 = vsel %vm72_vm4, %v66_v55, %v83_v62  ;;  %v81_v5 = vsel %vm71_vm5, %v78_v59, %v80_v2  ;;  %vm204_vm6 = vcmp.gt.s32.totalorder %v203_v63, 0  ;;  %v1099_v16 = vsel %vm71_vm5, %v74_v1, %v76_v4 }
  0x8c   :  { %v85_v6 = vsel %vm71_vm5, %v82_v60, %v84_v3  ;;  %v111_v12 = vand.u32 65535, %v81_v5  ;;  %v112_v13 = vshrl.u32 %v81_v5, 16  ;;  %v205_v19 = vsel %vm204_vm6, %v203_v63, 0 }
  0x8d   :  { %v89_v7 = vand.u32 65535, %v85_v6  ;;  %v90_v8 = vshrl.u32 %v85_v6, 16  ;;  %v207_v44 = vand.u32 31, %v205_v19  ;;  %v1105_v53 = vshrl.u32 %v205_v19, 5 }
  0x8e   :  { %v114_v24 = vmul.u32 %v112_v13, %v87_v30  ;;  %v115_v26 = vmul.u32 %v111_v12, %v88_v31  ;;  %v113_v32 = vmul.u32 %v111_v12, %v87_v30  ;;  %v116_v33 = vmul.u32 %v112_v13, %v88_v31 }
  0x8f   :  { %v92_v17 = vmul.u32 %v90_v8, %v87_v30  ;;  %v93_v18 = vmul.u32 %v89_v7, %v88_v31  ;;  %v91_v21 = vmul.u32 %v89_v7, %v87_v30  ;;  %v94_v22 = vmul.u32 %v90_v8, %v88_v31 }
  0x90   :  { %v117_v38 = vshll.u32 %v114_v24, 16  ;;  %v118_v39 = vshrl.u32 %v114_v24, 16  ;;  %v119_v42 = vshll.u32 %v115_v26, 16  ;;  %v120_v47 = vshrl.u32 %v115_v26, 16 }
  0x91   :  { %v95_v27 = vshll.u32 %v92_v17, 16  ;;  %v96_v29 = vshrl.u32 %v92_v17, 16  ;;  %v97_v35 = vshll.u32 %v93_v18, 16  ;;  %v98_v37 = vshrl.u32 %v93_v18, 16 }
  0x92   :  { %vm121_vm9 = vc.u32 %v113_v32, %v117_v38  ;;  %v123_v48 = vadd.s32 %v117_v38, %v113_v32  ;;  %v208_v31 = vsub.s32 32, %v207_v44  ;;  %v210_v57 = vshll.u32 %v1027_v34, %v207_v44 }
  0x93   :  { %vm99_vm8 = vc.u32 %v91_v21, %v95_v27  ;;  %v101_v41 = vadd.s32 %v95_v27, %v91_v21  ;;  %v122_v30 = vsel %vm121_vm9, 1, %v1026_v0  ;;  %v213_v60 = vshll.u32 %v1028_v36, %v207_v44 }
  0x94   :  { %v100_v45 = vsel %vm99_vm8, 1, %v1026_v0  ;;  %v124_v52 = vadd.s32 %v122_v30, %v116_v33  ;;  %vm125_vm11 = vc.u32 %v123_v48, %v119_v42  ;;  %v1108_v56 = vadd.s32 %v123_v48, %v119_v42 }
  0x95   :  { %v102_v50 = vadd.s32 %v100_v45, %v94_v22  ;;  %vm103_vm10 = vc.u32 %v101_v41, %v97_v35  ;;  %v126_v55 = vsel %vm125_vm11, 1, %v1026_v0  ;;  %v211_v59 = vshrl.u32 %v1028_v36, %v208_v31 }
  0x96   :  { %v104_v51 = vsel %vm103_vm10, 1, %v1026_v0  ;;  %v128_v58 = vadd.s32 %v126_v55, %v124_v52  ;;  %v214_v61 = vshrl.u32 %v1029_v40, %v208_v31  ;;  %v216_v63 = vshll.u32 %v1029_v40, %v207_v44 }
  0x97   :  { %v106_v54 = vadd.s32 %v104_v51, %v102_v50  ;;  %v217_v1 = vshrl.u32 %v1030_v43, %v208_v31  ;;  %v219_v2 = vshll.u32 %v1030_v43, %v207_v44  ;;  %v212_v4 = vor.u32 %v211_v59, %v210_v57 }
  0x98   :  { %v129_v3 = vadd.s32 %v128_v58, %v118_v39  ;;  %v215_v5 = vor.u32 %v214_v61, %v213_v60  ;;  %v220_v6 = vshrl.u32 %v1031_v46, %v208_v31  ;;  %v222_v12 = vshll.u32 %v1031_v46, %v207_v44 }
  0x99   :  { %v107_v62 = vadd.s32 %v106_v54, %v96_v29  ;;  %v218_v8 = vor.u32 %v217_v1, %v216_v63  ;;  %v223_v13 = vshrl.u32 %v1032_v49, %v208_v31  ;;  %v1124_v19 = vand.u32 8388607, %v348_v15 }
  0x9a   :  { %v130_v17 = vadd.s32 %v129_v3, %v120_v47  ;;  %v221_v18 = vor.u32 %v220_v6, %v219_v2  ;;  %v360_v21 = vsel %vm359_vm7, %v1078_v28, 0  ;;  %vm225_vm13 = vcmp.lt.s32.totalorder %v1105_v53, 1 }
  0x9b   :  { %v1118_v7 = vadd.s32 %v107_v62, %v98_v37  ;;  %v224_v22 = vor.u32 %v223_v13, %v222_v12  ;;  %v1132_v24 = vshll.u32 %v201_v14, 8  ;;  %v131_v26 = vmul.u32 %v1074_v23, %v1099_v16 }
  0x9c   :  { %v134_v27 = vadd.s32 1, %v130_v17  ;;  %vm228_vm14 = vcmp.lt.s32.totalorder %v1105_v53, 4  ;;  %v233_v29 = vsel %vm225_vm13, %v212_v4, %v215_v5  ;;  %vm227_vm15 = vcmp.lt.s32.totalorder %v1105_v53, 3 }
  0x9d   :  { %vm133_vm12 = vc.u32 %v1118_v7, %v1108_v56  ;;  %v234_v28 = vsel %vm228_vm14, %v221_v18, 920167782  ;;  %v237_v32 = vsel %vm225_vm13, %v215_v5, %v218_v8  ;;  %v238_v14 = vsel %vm228_vm14, %v224_v22, 1326507024 }
  0x9e   :  { %v135_v33 = vsel %vm133_vm12, %v134_v27, %v130_v17  ;;  %vm226_vm1 = vcmp.lt.s32.totalorder %v1105_v53, 2  ;;  %v235_v23 = vsel %vm227_vm15, %v218_v8, %v234_v28  ;;  %v239_v16 = vsel %vm227_vm15, %v221_v18, %v238_v14 }
  0x9f   :  { %v136_v35 = vadd.s32 %v135_v33, %v131_v26  ;;  %v236_v37 = vsel %vm226_vm1, %v233_v29, %v235_v23  ;;  %v240_v38 = vsel %vm226_vm1, %v237_v32, %v239_v16  ;;  %v242_v39 = vand.u32 65535, %v1132_v24 }
  0xa0   :  { %v243_v41 = vshrl.u32 %v1132_v24, 16  ;;  %v244_v42 = vand.u32 65535, %v240_v38  ;;  %v245_v44 = vshrl.u32 %v240_v38, 16  ;;  %v267_v45 = vshrl.u32 %v236_v37, 16 }
  0xa1   :  { %v137_v47 = vadd.s32 536870912, %v136_v35  ;;  %v266_v48 = vand.u32 65535, %v236_v37  ;;  %v209_v50 = vshrl.u32 %v1027_v34, %v208_v31  ;;  %v356_v52 = vor.u32 8388608, %v1124_v19 }
  0xa2   :  { %v247_v30 = vmul.u32 %v245_v44, %v242_v39  ;;  %v248_v51 = vmul.u32 %v244_v42, %v243_v41  ;;  %v269_v55 = vmul.u32 %v267_v45, %v242_v39  ;;  %v1161_v57 = vshrl.u32 %v360_v21, 5 }
  0xa3   :  { %v1159_v54 = vshrl.u32 %v137_v47, 30  ;;  %v1163_v58 = vand.u32 31, %v360_v21  ;;  %v229_v59 = vsel %vm225_vm13, %v209_v50, %v212_v4  ;;  %v230_v60 = vsel %vm228_vm14, %v218_v8, 2102212464 }
  0xa4   :  { %v246_v61 = vmul.u32 %v244_v42, %v242_v39  ;;  %v250_v62 = vshll.u32 %v247_v30, 16  ;;  %v249_v63 = vmul.u32 %v245_v44, %v243_v41  ;;  %v268_v1 = vmul.u32 %v266_v48, %v242_v39 }
  0xa5   :  { %v139_v31 = vshll.u32 %v1159_v54, 30  ;;  %v272_v2 = vshll.u32 %v269_v55, 16  ;;  %v252_v3 = vshll.u32 %v248_v51, 16  ;;  %v270_v12 = vmul.u32 %v266_v48, %v243_v41 }
  0xa6   :  { %vm254_vm2 = vc.u32 %v246_v61, %v250_v62  ;;  %v256_v6 = vadd.s32 %v250_v62, %v246_v61  ;;  %v231_v17 = vsel %vm227_vm15, %v215_v5, %v230_v60  ;;  %v1174_v18 = vsub.s32 32, %v1163_v58 }
  0xa7   :  { %v140_v13 = vsub.s32 %v136_v35, %v139_v31  ;;  %v255_v4 = vsel %vm254_vm2, 1, %v1026_v0  ;;  %v251_v8 = vshrl.u32 %v247_v30, 16  ;;  %vm276_vm4 = vc.u32 %v268_v1, %v272_v2 }
  0xa8   :  { %v257_v21 = vadd.s32 %v255_v4, %v249_v63  ;;  %vm258_vm3 = vc.u32 %v256_v6, %v252_v3  ;;  %v271_v27 = vmul.u32 %v267_v45, %v243_v41  ;;  %v274_v28 = vshll.u32 %v270_v12, 16 }
  0xa9   :  { %vm141_vm5 = vcmp.lt.s32.totalorder %v140_v13, 0  ;;  %v142_v22 = vsub.s32 0, %v140_v13  ;;  %v259_v26 = vsel %vm258_vm3, 1, %v1026_v0  ;;  %v277_v32 = vsel %vm276_vm4, 1, %v1026_v0 }
  0xaa   :  { %v261_v29 = vadd.s32 %v259_v26, %v257_v21  ;;  %v278_v14 = vadd.s32 %v272_v2, %v268_v1  ;;  %v132_v5 = vadd.s32 %v1108_v56, %v1118_v7  ;;  %v232_v23 = vsel %vm226_vm1, %v229_v59, %v231_v17 }
  0xab   :  { %v143_v33 = vsel %vm141_vm5, %v142_v22, %v140_v13  ;;  %v279_v16 = vadd.s32 %v277_v32, %v271_v27  ;;  %v253_v37 = vshrl.u32 %v248_v51, 16  ;;  %v273_v39 = vshrl.u32 %v269_v55, 16 }
  0xac   :  { %v144_v35 = vclz %v143_v33  ;;  %v262_v38 = vadd.s32 %v261_v29, %v251_v8  ;;  %vm280_vm6 = vc.u32 %v278_v14, %v274_v28  ;;  %v365_v42 = vshll.u32 %v1027_v34, %v1163_v58 }
  0xad   :  { %v281_v41 = vsel %vm280_vm6, 1, %v1026_v0  ;;  %v366_v44 = vshrl.u32 %v1028_v36, %v1174_v18  ;;  %v1189_v7 = vadd.s32 %v278_v14, %v274_v28  ;;  %v368_v47 = vshll.u32 %v1028_v36, %v1163_v58 }
  0xae   :  { %v1000_v45 = vadd.s32 4294967294, %v144_v35  ;;  %v1187_v56 = vadd.s32 %v262_v38, %v253_v37  ;;  %v283_v53 = vadd.s32 %v281_v41, %v279_v16  ;;  %v369_v48 = vshrl.u32 %v1029_v40, %v1174_v18 }
  0xaf   :  { %v371_v50 = vshll.u32 %v1029_v40, %v1163_v58  ;;  %v372_v30 = vshrl.u32 %v1030_v43, %v1174_v18  ;;  %v275_v51 = vshrl.u32 %v270_v12, 16  ;;  %v286_v59 = vmul.u32 %v1132_v24, %v232_v23 }
  0xb0   :  { %vm1001_vm7 = vcmp.lt.s32.totalorder %v1000_v45, 0  ;;  %v284_v55 = vadd.s32 %v283_v53, %v273_v39  ;;  %vm288_vm8 = vc.u32 %v1187_v56, %v1189_v7  ;;  %v1202_v61 = vor.u32 %v366_v44, %v365_v42 }
  0xb1   :  { %v147_v60 = vsel %vm1001_vm7, 0, %v1000_v45  ;;  %v374_v36 = vshll.u32 %v1030_v43, %v1163_v58  ;;  %v1206_v63 = vor.u32 %v369_v48, %v368_v47  ;;  %v1208_v1 = vor.u32 %v372_v30, %v371_v50 }
  0xb2   :  { %v148_v62 = vsub.s32 32, %v147_v60  ;;  %v152_v31 = vsub.s32 4294967266, %v147_v60  ;;  %v285_v40 = vadd.s32 %v284_v55, %v275_v51  ;;  %v375_v2 = vshrl.u32 %v1031_v46, %v1174_v18 }
  0xb3   :  { %v377_v24 = vshll.u32 %v1031_v46, %v1163_v58  ;;  %v378_v3 = vshrl.u32 %v1032_v49, %v1174_v18  ;;  %v149_v6 = vshll.u32 %v140_v13, %v147_v60  ;;  %vm380_vm9 = vcmp.lt.s32.totalorder %v1161_v57, 1 }
  0xb4   :  { %v150_v12 = vshrl.u32 %v132_v5, %v148_v62  ;;  %v153_v17 = vadd.s32 127, %v152_v31  ;;  %v289_v43 = vadd.s32 1, %v285_v40  ;;  %v376_v4 = vor.u32 %v375_v2, %v374_v36 }
  0xb5   :  { %v379_v8 = vor.u32 %v378_v3, %v377_v24  ;;  %vm383_vm10 = vcmp.lt.s32.totalorder %v1161_v57, 4  ;;  %vm382_vm11 = vcmp.lt.s32.totalorder %v1161_v57, 3  ;;  %vm381_vm12 = vcmp.lt.s32.totalorder %v1161_v57, 2 }
  0xb6   :  { %v151_v21 = vor.u32 %v150_v12, %v149_v6  ;;  %v154_v22 = vshll.u32 %v153_v17, 23  ;;  %v290_v26 = vsel %vm288_vm8, %v289_v43, %v285_v40  ;;  %v389_v49 = vsel %vm383_vm10, %v376_v4, 920167782 }
  0xb7   :  { %v291_v46 = vadd.s32 %v290_v26, %v286_v59  ;;  %v388_v27 = vsel %vm380_vm9, %v1202_v61, %v1206_v63  ;;  %v390_v29 = vsel %vm382_vm11, %v1208_v1, %v389_v49  ;;  %v392_v28 = vsel %vm380_vm9, %v1206_v63, %v1208_v1 }
  0xb8   :  { %v155_v58 = vor.u32 4788187, %v154_v22  ;;  %v158_v14 = vcvt.s32.f32 %v151_v21  ;;  %v393_v5 = vsel %vm383_vm10, %v379_v8, 1326507024  ;;  %v1240_v33 = vshll.u32 %v356_v52, 8 }
  0xb9   :  { %v292_v13 = vadd.s32 536870912, %v291_v46  ;;  %v394_v16 = vsel %vm382_vm11, %v376_v4, %v393_v5  ;;  %v391_v37 = vsel %vm381_vm12, %v388_v27, %v390_v29  ;;  %vm40_vm13 = vcmp.lt.s32.totalorder %v1063_v9, 0 }
  0xba   :  { %v156_v32 = vand.u32 2147483647, %v155_v58  ;;  %v395_v38 = vsel %vm381_vm12, %v392_v28, %v394_v16  ;;  %v397_v41 = vand.u32 65535, %v1240_v33  ;;  %v422_v53 = vshrl.u32 %v391_v37, 16 }
  0xbb   :  { %v1242_v23 = vshrl.u32 %v292_v13, 30  ;;  %v400_v42 = vshrl.u32 %v395_v38, 16  ;;  %v399_v52 = vand.u32 65535, %v395_v38  ;;  %vm1255_vm14 = vcmp.le.f32.partialorder %v38_v11, 0.7853982 }
  0xbc   :  { %v159_v35 = vmul.f32 %v158_v14, %v156_v32  ;;  %v398_v50 = vshrl.u32 %v1240_v33, 16  ;;  %v421_v36 = vand.u32 65535, %v391_v37  ;;  %v424_v62 = vmul.u32 %v422_v53, %v397_v41 }
  0xbd   :  { %v294_v39 = vshll.u32 %v1242_v23, 30  ;;  %v402_v45 = vmul.u32 %v400_v42, %v397_v41  ;;  %v401_v55 = vmul.u32 %v399_v52, %v397_v41  ;;  %v364_v22 = vshrl.u32 %v1027_v34, %v1174_v18 }
  0xbe   :  { %v160_v19 = vxor.u32 2147483648, %v159_v35  ;;  %v403_v59 = vmul.u32 %v399_v52, %v398_v50  ;;  %v404_v2 = vmul.u32 %v400_v42, %v398_v50  ;;  %v425_v17 = vmul.u32 %v421_v36, %v398_v50 }
  0xbf   :  { %v295_v44 = vsub.s32 %v291_v46, %v294_v39  ;;  %v405_v60 = vshll.u32 %v402_v45, 16  ;;  %v423_v4 = vmul.u32 %v421_v36, %v397_v41  ;;  %v427_v8 = vshll.u32 %v424_v62, 16 }
  0xc0   :  { %v161_v48 = vsel %vm40_vm13, %v160_v19, %v159_v35  ;;  %v407_v6 = vshll.u32 %v403_v59, 16  ;;  %v287_v26 = vadd.s32 %v1189_v7, %v1187_v56  ;;  %v406_v13 = vshrl.u32 %v402_v45, 16 }
  0xc1   :  { %v1265_v30 = vsel %vm1255_vm14, %v1063_v9, %v161_v48  ;;  %vm296_vm15 = vcmp.lt.s32.totalorder %v295_v44, 0  ;;  %v297_v51 = vsub.s32 0, %v295_v44  ;;  %vm409_vm1 = vc.u32 %v401_v55, %v405_v60 }
  0xc2   :  { %v1269_v31 = vmul.f32 %v1265_v30, %v1265_v30  ;;  %v410_v24 = vsel %vm409_vm1, 1, %v1026_v0  ;;  %v411_v12 = vadd.s32 %v405_v60, %v401_v55  ;;  %vm431_vm4 = vc.u32 %v423_v4, %v427_v8 }
  0xc3   :  { %v298_v11 = vsel %vm296_vm15, %v297_v51, %v295_v44  ;;  %v412_v43 = vadd.s32 %v410_v24, %v404_v2  ;;  %v426_v27 = vmul.u32 %v422_v53, %v398_v50  ;;  %v429_v29 = vshll.u32 %v425_v17, 16 }
  0xc4   :  { %v299_v40 = vclz %v298_v11  ;;  %v174_v21 = vmul.f32 -0.00019511016, %v1269_v31  ;;  %vm413_vm3 = vc.u32 %v411_v12, %v407_v6  ;;  %v432_v14 = vsel %vm431_vm4, 1, %v1026_v0 }
  0xc5   :  { %v414_v49 = vsel %vm413_vm3, 1, %v1026_v0  ;;  %v433_v5 = vadd.s32 %v427_v8, %v423_v4  ;;  %v385_v34 = vsel %vm383_vm10, %v1208_v1, 2102212464  ;;  %v434_v18 = vadd.s32 %v432_v14, %v426_v27 }
  0xc6   :  { %v1003_v3 = vadd.s32 4294967294, %v299_v40  ;;  %v416_v32 = vadd.s32 %v414_v49, %v412_v43  ;;  %v175_v16 = vadd.f32 0.008332121, %v174_v21  ;;  %v167_v38 = vmul.f32 -0.001358992, %v1269_v31 }
  0xc7   :  { %vm435_vm5 = vc.u32 %v433_v5, %v429_v29  ;;  %v408_v39 = vshrl.u32 %v403_v59, 16  ;;  %v428_v52 = vshrl.u32 %v424_v62, 16  ;;  %v384_v1 = vsel %vm380_vm9, %v364_v22, %v1202_v61 }
  0xc8   :  { %vm1004_vm2 = vcmp.lt.s32.totalorder %v1003_v3, 0  ;;  %v417_v37 = vadd.s32 %v416_v32, %v406_v13  ;;  %v436_v41 = vsel %vm435_vm5, 1, %v1026_v0  ;;  %v176_v53 = vmul.f32 %v175_v16, %v1269_v31 }
  0xc9   :  { %v302_v46 = vsel %vm1004_vm2, 0, %v1003_v3  ;;  %v438_v45 = vadd.s32 %v436_v41, %v434_v18  ;;  %v430_v51 = vshrl.u32 %v425_v17, 16  ;;  %v168_v0 = vadd.f32 0.041655596, %v167_v38 }
  0xca   :  { %v303_v58 = vsub.s32 32, %v302_v46  ;;  %v307_v28 = vsub.s32 4294967266, %v302_v46  ;;  %v304_v56 = vshll.u32 %v295_v44, %v302_v46  ;;  %v386_v44 = vsel %vm382_vm11, %v1206_v63, %v385_v34 }
  0xcb   :  { %v1291_v48 = vadd.s32 %v417_v37, %v408_v39  ;;  %v439_v55 = vadd.s32 %v438_v45, %v428_v52  ;;  %v1293_v59 = vadd.s32 %v433_v5, %v429_v29  ;;  %v387_v11 = vsel %vm381_vm12, %v384_v1, %v386_v44 }
  0xcc   :  { %v305_v35 = vshrl.u32 %v287_v26, %v303_v58  ;;  %v308_v7 = vadd.s32 127, %v307_v28  ;;  %v177_v40 = vadd.f32 -0.16666654, %v176_v53  ;;  %v162_v61 = vsub.s32 4, %v1159_v54 }
  0xcd   :  { %v440_v62 = vadd.s32 %v439_v55, %v430_v51  ;;  %vm443_vm6 = vc.u32 %v1291_v48, %v1293_v59  ;;  %v169_v24 = vmul.f32 %v168_v0, %v1269_v31  ;;  %v441_v3 = vmul.u32 %v1240_v33, %v387_v11 }
  0xce   :  { %v306_v42 = vor.u32 %v305_v35, %v304_v56  ;;  %v309_v19 = vshll.u32 %v308_v7, 23  ;;  %v317_v12 = vsub.s32 4, %v1242_v23  ;;  %v178_v57 = vmul.f32 %v177_v40, %v1269_v31 }
  0xcf   :  { %v444_v2 = vadd.s32 1, %v440_v62  ;;  %vm195_vm7 = vcmp.lt.s32.totalorder %v1072_v20, 0  ;;  %v163_v4 = vsel %vm40_vm13, %v162_v61, %v1159_v54  ;;  %vm194_vm8 = vcmp.le.f32.partialorder %v193_v25, 0.7853982 }
  0xd0   :  { %v310_v50 = vor.u32 4788187, %v309_v19  ;;  %v313_v36 = vcvt.s32.f32 %v306_v42  ;;  %v170_v21 = vadd.f32 -0.4999988, %v169_v24  ;;  %v318_v26 = vsel %vm195_vm7, %v317_v12, %v1242_v23 }
  0xd1   :  { %v445_v17 = vsel %vm443_vm6, %v444_v2, %v440_v62  ;;  %v165_v49 = vsel %vm1255_vm14, 0, %v163_v4  ;;  %v179_v58 = vadd.f32 1.0, %v178_v57  ;;  %v320_v28 = vsel %vm194_vm8, 0, %v318_v26 }
  0xd2   :  { %v311_v60 = vand.u32 2147483647, %v310_v50  ;;  %v446_v43 = vadd.s32 %v445_v17, %v441_v3  ;;  %v171_v54 = vmul.f32 %v170_v21, %v1269_v31  ;;  %v182_v32 = vadd.s32 3, %v165_v49 }
  0xd3   :  { %v180_v16 = vmul.f32 %v179_v58, %v1265_v30  ;;  %v337_v47 = vadd.s32 3, %v320_v28  ;;  %vm181_vm10 = vweird.f32 %v1063_v9  ;;  %vm336_vm11 = vweird.f32 %v1072_v20 }
  0xd4   :  { %v314_v63 = vmul.f32 %v313_v36, %v311_v60  ;;  %v447_v22 = vadd.s32 536870912, %v446_v43  ;;  %v172_v18 = vadd.f32 1.0, %v171_v54  ;;  %v183_v7 = vand.u32 3, %v182_v32 }
  0xd5   :  { %v186_v39 = vxor.u32 2147483648, %v180_v16  ;;  %v338_v19 = vand.u32 3, %v337_v47  ;;  %v647_v50 = vand.u32 3, %v165_v49  ;;  %v442_v60 = vadd.s32 %v1293_v59, %v1291_v48 }
  0xd6   :  { %v315_v6 = vxor.u32 2147483648, %v314_v63  ;;  %v1314_v13 = vshrl.u32 %v447_v22, 30  ;;  %v189_v45 = vxor.u32 2147483648, %v172_v18  ;;  %vm185_vm12 = vcmp.eq.s32.totalorder %v183_v7, 0 }
  0xd7   :  { %vm184_vm13 = vcmp.lt.s32.totalorder %v183_v7, 2  ;;  %v187_v44 = vsel %vm185_vm12, %v172_v18, %v186_v39  ;;  %vm188_vm14 = vcmp.eq.s32.totalorder %v183_v7, 2  ;;  %vm339_vm15 = vcmp.lt.s32.totalorder %v338_v19, 2 }
  0xd8   :  { %v316_v8 = vsel %vm195_vm7, %v315_v6, %v314_v63  ;;  %v449_v25 = vshll.u32 %v1314_v13, 30  ;;  %v190_v0 = vsel %vm188_vm14, %v189_v45, %v180_v16  ;;  %vm340_vm2 = vcmp.eq.s32.totalorder %v338_v19, 0 }
  0xd9   :  { %v319_v33 = vsel %vm194_vm8, %v1072_v20, %v316_v8  ;;  %v191_v11 = vsel %vm184_vm13, %v187_v44, %v190_v0  ;;  %v801_v61 = vand.u32 3, %v320_v28  ;;  %vm343_vm3 = vcmp.eq.s32.totalorder %v338_v19, 2 }
  0xda   :  { %v321_v46 = vmul.f32 %v319_v33, %v319_v33  ;;  %v450_v23 = vsub.s32 %v446_v43, %v449_v25  ;;  %vm648_vm4 = vcmp.lt.s32.totalorder %v647_v50, 2  ;;  %vm649_vm5 = vcmp.eq.s32.totalorder %v647_v50, 0 }
  0xdb   :  { %v192_v12 = vsel %vm181_vm10, nan, %v191_v11  ;;  %vm652_vm6 = vcmp.eq.s32.totalorder %v647_v50, 2  ;;  %vm803_vm7 = vcmp.eq.s32.totalorder %v801_v61, 0  ;;  %vm806_vm8 = vcmp.eq.s32.totalorder %v801_v61, 2 }
  0xdc   :  { %v322_v27 = vmul.f32 -0.001358992, %v321_v46  ;;  %v329_v29 = vmul.f32 -0.00019511016, %v321_v46  ;;  %vm451_vm9 = vcmp.lt.s32.totalorder %v450_v23, 0  ;;  %v452_v56 = vsub.s32 0, %v450_v23 }
  0xdd   :  { %v651_v4 = vsel %vm649_vm5, %v172_v18, %v186_v39  ;;  %v654_v8 = vsel %vm652_vm6, %v189_v45, %v180_v16  ;;  %v969_v26 = vrot.slane %v192_v12, 4 }
  0xde   :  { %v323_v14 = vadd.f32 0.041655596, %v322_v27  ;;  %v330_v5 = vadd.f32 0.008332121, %v329_v29  ;;  %v453_v31 = vsel %vm451_vm9, %v452_v56, %v450_v23  ;;  %vm802_vm9 = vcmp.lt.s32.totalorder %v801_v61, 2 }
  0xdf   :  { %v454_v52 = vclz %v453_v31 }
  0xe0   :  { %v324_v35 = vmul.f32 %v323_v14, %v321_v46  ;;  %v331_v34 = vmul.f32 %v330_v5, %v321_v46 }
  0xe1   :  { %v1006_v1 = vadd.s32 4294967294, %v454_v52 }
  0xe2   :  { %v325_v37 = vadd.f32 -0.4999988, %v324_v35  ;;  %v332_v38 = vadd.f32 -0.16666654, %v331_v34  ;;  %v472_v34 = vsub.s32 4, %v1314_v13 }
  0xe3   :  { %vm1007_vm1 = vcmp.lt.s32.totalorder %v1006_v1, 0 }
  0xe4   :  { %v326_v41 = vmul.f32 %v325_v37, %v321_v46  ;;  %v333_v42 = vmul.f32 %v332_v38, %v321_v46  ;;  %v457_v36 = vsel %vm1007_vm1, 0, %v1006_v1 }
  0xe5   :  { %v458_v40 = vsub.s32 32, %v457_v36  ;;  %v462_v63 = vsub.s32 4294967266, %v457_v36  ;;  %v459_v3 = vshll.u32 %v450_v23, %v457_v36 }
  0xe6   :  { %v327_v30 = vadd.f32 1.0, %v326_v41  ;;  %v334_v53 = vadd.f32 1.0, %v333_v42 }
  0xe7   :  { %v460_v6 = vshrl.u32 %v442_v60, %v458_v40  ;;  %v463_v57 = vadd.s32 127, %v462_v63 }
  0xe8   :  { %v335_v51 = vmul.f32 %v334_v53, %v319_v33  ;;  %v344_v55 = vxor.u32 2147483648, %v327_v30  ;;  %v655_v33 = vsel %vm648_vm4, %v651_v4, %v654_v8 }
  0xe9   :  { %v461_v59 = vor.u32 %v460_v6, %v459_v3  ;;  %v464_v43 = vshll.u32 %v463_v57, 23  ;;  %v656_v49 = vsel %vm181_vm10, nan, %v655_v33  ;;  %vm350_vm10 = vcmp.lt.s32.totalorder %v1065_v10, 0 }
  0xea   :  { %v341_v62 = vxor.u32 2147483648, %v335_v51  ;;  %v345_v24 = vsel %vm343_vm3, %v344_v55, %v335_v51  ;;  %v808_v22 = vsel %vm806_vm8, %v344_v55, %v335_v51  ;;  %v966_v54 = vrot.slane %v656_v49, 4 }
  0xeb   :  { %v465_v46 = vor.u32 4788187, %v464_v43  ;;  %v984_v28 = vsel %vm15_vm0, %v969_v26, %v656_v49  ;;  %v468_v32 = vcvt.s32.f32 %v461_v59  ;;  %v473_v37 = vsel %vm350_vm10, %v472_v34, %v1314_v13 }
  0xec   :  { %v342_v2 = vsel %vm340_vm2, %v327_v30, %v341_v62  ;;  %v805_v21 = vsel %vm803_vm7, %v327_v30, %v341_v62  ;;  %990 = vst [vmem:[%s1366_s2 + $0x8] sm:$0xff] %v984_v28  ;;  %v983_v9 = vsel %vm15_vm0, %v192_v12, %v966_v54  ;;  %vm491_vm3 = vweird.f32 %v1065_v10 }
  0xed   :  { %v346_v17 = vsel %vm339_vm15, %v342_v2, %v345_v24  ;;  %v809_v58 = vsel %vm802_vm9, %v805_v21, %v808_v22  ;;  %v466_v25 = vand.u32 2147483647, %v465_v46  ;;  %989 = vst [vmem:[%s1366_s2] sm:$0xff] %v983_v9 }
  0xee   :  { %v347_v48 = vsel %vm336_vm11, nan, %v346_v17  ;;  %v810_v29 = vsel %vm336_vm11, nan, %v809_v58  ;;  %vm349_vm11 = vcmp.le.f32.partialorder %v348_v15, 0.7853982 }
  0xef   :  { %v975_v27 = vrot.slane %v347_v48, 4  ;;  %v972_v14 = vrot.slane %v810_v29, 4  ;;  %v469_v20 = vmul.f32 %v468_v32, %v466_v25  ;;  %v475_v31 = vsel %vm349_vm11, 0, %v473_v37 }
  0xf0   :  { %v492_v45 = vadd.s32 3, %v475_v31  ;;  %v955_v44 = vand.u32 3, %v475_v31 }
  0xf1   :  { %v986_v5 = vsel %vm15_vm0, %v975_v27, %v810_v29  ;;  %v985_v16 = vsel %vm15_vm0, %v347_v48, %v972_v14  ;;  %v470_v23 = vxor.u32 2147483648, %v469_v20 }
  0xf2   :  { %992 = vst [vmem:[%s1366_s2 + $0x18] sm:$0xff] %v986_v5  ;;  %v493_v50 = vand.u32 3, %v492_v45  ;;  %vm956_vm12 = vcmp.lt.s32.totalorder %v955_v44, 2  ;;  %vm957_vm13 = vcmp.eq.s32.totalorder %v955_v44, 0  ;;  %vm960_vm2 = vcmp.eq.s32.totalorder %v955_v44, 2 }
  0xf3   :  { %991 = vst [vmem:[%s1366_s2 + $0x10] sm:$0xff] %v985_v16  ;;  %v471_v35 = vsel %vm350_vm10, %v470_v23, %v469_v20 }
  0xf4   :  { %v474_v47 = vsel %vm349_vm11, %v1065_v10, %v471_v35  ;;  %vm494_vm14 = vcmp.lt.s32.totalorder %v493_v50, 2  ;;  %vm495_vm15 = vcmp.eq.s32.totalorder %v493_v50, 0  ;;  %vm498_vm1 = vcmp.eq.s32.totalorder %v493_v50, 2 }
  0xf5   :  { %v476_v18 = vmul.f32 %v474_v47, %v474_v47 }
  0xf7   :  { %v477_v56 = vmul.f32 -0.001358992, %v476_v18  ;;  %v484_v7 = vmul.f32 -0.00019511016, %v476_v18 }
  0xf9   :  { %v478_v38 = vadd.f32 0.041655596, %v477_v56  ;;  %v485_v39 = vadd.f32 0.008332121, %v484_v7 }
  0xfb   :  { %v479_v41 = vmul.f32 %v478_v38, %v476_v18  ;;  %v486_v42 = vmul.f32 %v485_v39, %v476_v18 }
  0xfd   :  { %v480_v19 = vadd.f32 -0.4999988, %v479_v41  ;;  %v487_v52 = vadd.f32 -0.16666654, %v486_v42 }
  0xff   :  { %v481_v30 = vmul.f32 %v480_v19, %v476_v18  ;;  %v488_v15 = vmul.f32 %v487_v52, %v476_v18 }
 0x101   :  { %v482_v53 = vadd.f32 1.0, %v481_v30  ;;  %v489_v1 = vadd.f32 1.0, %v488_v15 }
 0x103   :  { %v490_v51 = vmul.f32 %v489_v1, %v474_v47  ;;  %v499_v55 = vxor.u32 2147483648, %v482_v53 }
 0x105   :  { %v496_v0 = vxor.u32 2147483648, %v490_v51  ;;  %v500_v60 = vsel %vm498_vm1, %v499_v55, %v490_v51  ;;  %v962_v11 = vsel %vm960_vm2, %v499_v55, %v490_v51 }
 0x107   :  { %v497_v13 = vsel %vm495_vm15, %v482_v53, %v496_v0  ;;  %v959_v36 = vsel %vm957_vm13, %v482_v53, %v496_v0 }
 0x108   :  { %v501_v62 = vsel %vm494_vm14, %v497_v13, %v500_v60  ;;  %v963_v40 = vsel %vm956_vm12, %v959_v36, %v962_v11 }
 0x109   :  { %v502_v61 = vsel %vm491_vm3, nan, %v501_v62  ;;  %v964_v63 = vsel %vm491_vm3, nan, %v963_v40 }
 0x10a   :  { %v978_v2 = vrot.slane %v964_v63, 4  ;;  %v981_v24 = vrot.slane %v502_v61, 4 }
 0x10c   :  { %v987_v3 = vsel %vm15_vm0, %v502_v61, %v978_v2  ;;  %v988_v6 = vsel %vm15_vm0, %v981_v24, %v964_v63 }
 0x10d   :  { %993 = vst [vmem:[%s1366_s2 + $0x20] sm:$0xff] %v987_v3 }
 0x10e   :  { %994 = vst [vmem:[%s1366_s2 + $0x28] sm:$0xff] %v988_v6 }

</bundles_post_ra>
